<compile_context>
chip_gen: v5e
topology: v5e:2x2
jax: 0.10.0
libtpu: 0.0.40
codegen_flags: <defaults>
</compile_context>

<pallas_src>
import jax
import jax.numpy as jnp
from jax.experimental import pallas as pl
from jax.experimental.pallas import tpu as pltpu

LANE = 128                 # TPU lane width; hidden/output padded to this.
GATE_PERM = (0, 1, 3, 2)   # PyTorch gate order (i, f, g, o) -> packed (i, f, o, g)


def lstm_last_pred_kernel(x_ref, wih_ref, whh_ref, b_ref, wlin_ref, blin_ref,
                          out_ref):
    """Whole-sequence LSTM + final linear; single grid point, operands in VMEM.

    x_ref    : (seq_len, input_size)  f32
    wih_ref  : (input_size, 4*Hp)     bf16  (gate-packed weight_ih_l0, transposed)
    whh_ref  : (Hp, 4*Hp)             bf16  (gate-packed weight_hh_l0, transposed)
    b_ref    : (1, 4*Hp)              f32   (gate-packed bias_ih + bias_hh)
    wlin_ref : (Hp, OUT_PAD)          bf16  (padded linear.weight, transposed)
    blin_ref : (1, OUT_PAD)           f32   (padded linear.bias)
    out_ref  : (1, OUT_PAD)           f32
    """
    seq_len = x_ref.shape[0]
    hp = whh_ref.shape[0]  # padded hidden size (multiple of 128)

    # --- Hoisted input projection (off the serial chain), kept as SSA values.
    # At seq_len=8 this is only 4 vregs; no VMEM scratch round-trip needed.
    gx = (jnp.dot(x_ref[...].astype(jnp.bfloat16), wih_ref[...],
                  preferred_element_type=jnp.float32)
          + b_ref[...])                                       # (seq_len, 4*Hp) f32

    h = jnp.zeros((1, hp), jnp.bfloat16)
    c = jnp.zeros((1, hp), jnp.float32)

    # Fully unrolled recurrence (static trip count, static slices).  W_hh is
    # streamed from its VMEM ref each step rather than hoisted into vregs.
    # TODO(synk): stage W_hh once in MXU weight registers via
    # pltpu.matmul_push_rhs / matmul_acc_lhs / matmul_pop so only the (1,128)
    # h push sits on the serial per-step chain.
    for t in range(seq_len):
        gates = gx[t:t + 1, :] + jnp.dot(
            h, whh_ref[...], preferred_element_type=jnp.float32)   # (1, 4*Hp) f32
        # Packed gate order (i, f, o, g): one wide sigmoid + one tanh per step.
        sig = jax.nn.sigmoid(gates[:, :3 * hp])
        g_g = jnp.tanh(gates[:, 3 * hp:])
        i_g = sig[:, 0 * hp:1 * hp]
        f_g = sig[:, 1 * hp:2 * hp]
        o_g = sig[:, 2 * hp:3 * hp]
        c = f_g * c + i_g * g_g
        h = (o_g * jnp.tanh(c)).astype(jnp.bfloat16)

    # predictions[-1] = linear(h_T); lane-dense (1, OUT_PAD) unmasked store.
    out_ref[...] = (
        jnp.dot(h, wlin_ref[...], preferred_element_type=jnp.float32)
        + blin_ref[...]
    ).astype(out_ref.dtype)


def _round_up(n, m):
    return ((n + m - 1) // m) * m


def prepare_params(w_ih, w_hh, b_ih, b_hh, w_lin, b_lin):
    """Pad hidden/output to 128 lanes, reorder gates to (i,f,o,g), pre-transpose,
    and pre-cast matmul weights to bf16 (MXU-native); biases stay f32.

    PyTorch shapes in:
      w_ih (4H, I), w_hh (4H, H), b_ih/b_hh (4H,), w_lin (O, H), b_lin (O,)
    Padded hidden units see zero weights/bias -> gates = 0 there ->
    c_pad stays 0, h_pad = sigmoid(0)*tanh(0) = 0, and zero linear rows, so
    the padding is numerically inert.
    """
    hidden = w_hh.shape[1]
    output_size = w_lin.shape[0]
    hp = _round_up(hidden, LANE)
    out_pad = _round_up(output_size, LANE)
    perm = jnp.array(GATE_PERM)

    def pack_gate_rows(w):  # (4*hidden, K) -> (4*hp, K), reorder + per-gate pad
        g = w.reshape(4, hidden, -1)[perm]
        g = jnp.pad(g, ((0, 0), (0, hp - hidden), (0, 0)))
        return g.reshape(4 * hp, -1)

    w_ih_p = pack_gate_rows(w_ih)                                       # (4Hp, I)
    w_hh_p = jnp.pad(pack_gate_rows(w_hh), ((0, 0), (0, hp - hidden)))  # (4Hp, Hp)

    b = (b_ih + b_hh).reshape(4, hidden)[perm]
    b_p = jnp.pad(b, ((0, 0), (0, hp - hidden))).reshape(1, 4 * hp)

    w_lin_p = jnp.pad(w_lin, ((0, out_pad - output_size), (0, hp - hidden)))
    b_lin_p = jnp.pad(b_lin, (0, out_pad - output_size)).reshape(1, out_pad)

    # Pre-transpose so the kernel does row-vector matmuls; bf16 weights.
    return (w_ih_p.T.astype(jnp.bfloat16),
            w_hh_p.T.astype(jnp.bfloat16),
            b_p.astype(jnp.float32),
            w_lin_p.T.astype(jnp.bfloat16),
            b_lin_p.astype(jnp.float32))


def lstm_model_forward(x, params, output_size):
    """x: (seq_len, input_size) f32. Returns (output_size,) == PyTorch predictions[-1]."""
    wih_t, whh_t, bias, wlin_t, blin = params
    seq_len, input_size = x.shape
    hp = whh_t.shape[0]
    out_pad = wlin_t.shape[1]

    flops = (seq_len * 2 * input_size * 4 * hp      # input projection
             + seq_len * 2 * hp * 4 * hp            # recurrent matmul
             + 2 * hp * out_pad)                    # final linear
    transcendentals = seq_len * 5 * hp              # sigmoid(3Hp)+tanh(Hp)+tanh(Hp)
    bytes_accessed = (4 * (x.size + bias.size + blin.size + out_pad)
                      + 2 * (wih_t.size + whh_t.size + wlin_t.size))   # bf16 weights

    vmem = pl.BlockSpec(memory_space=pltpu.MemorySpace.VMEM)
    out = pl.pallas_call(
        lstm_last_pred_kernel,
        out_shape=jax.ShapeDtypeStruct((1, out_pad), jnp.float32),
        in_specs=[vmem] * 6,
        out_specs=vmem,
        cost_estimate=pl.CostEstimate(
            flops=flops,
            transcendentals=transcendentals,
            bytes_accessed=bytes_accessed),
    )(x, wih_t, whh_t, bias, wlin_t, blin)
    # TODO(synk): this kernel is launch/latency-bound (~1 MFLOP, <0.5 MiB): when
    # serving many sliding windows, pack B<=8 windows into the sublane dim of
    # x/h/c and add a 'parallel' grid axis over window groups (2 TCs on v7x).
    # TODO(synk): for long seq_len, chunk the hoisted input projection over a
    # grid axis ('arbitrary' semantics, h/c carried in scratch) instead of
    # materializing gx for the whole sequence, and set vmem_limit_bytes.
    return out[0, :output_size]


def reference_forward(x, w_ih, w_hh, b_ih, b_hh, w_lin, b_lin):
    """Pure-JAX f32 reference mirroring PyTorch nn.LSTM + Linear semantics."""
    hidden = w_hh.shape[1]
    wih_t, whh_t = w_ih.T, w_hh.T
    bias = (b_ih + b_hh).reshape(1, -1)
    h = jnp.zeros((1, hidden), jnp.float32)
    c = jnp.zeros((1, hidden), jnp.float32)
    for t in range(x.shape[0]):
        gates = x[t:t + 1] @ wih_t + h @ whh_t + bias
        i_g = jax.nn.sigmoid(gates[:, 0 * hidden:1 * hidden])
        f_g = jax.nn.sigmoid(gates[:, 1 * hidden:2 * hidden])
        g_g = jnp.tanh(gates[:, 2 * hidden:3 * hidden])
        o_g = jax.nn.sigmoid(gates[:, 3 * hidden:4 * hidden])
        c = f_g * c + i_g * g_g
        h = o_g * jnp.tanh(c)
    return (h @ w_lin.T + b_lin.reshape(1, -1))[0]


if __name__ == "__main__":
    # Small shapes consistent with the module: seq=8, input=16,
    # hidden_layer_size=100 (as in the spec), output_size=2.
    seq_len, input_size, hidden, output_size = 8, 16, 100, 2

    key = jax.random.PRNGKey(0)
    ks = jax.random.split(key, 7)
    s = 1.0 / jnp.sqrt(hidden)
    x = jax.random.normal(ks[0], (seq_len, input_size), jnp.float32)
    w_ih = jax.random.uniform(ks[1], (4 * hidden, input_size), jnp.float32, -s, s)
    w_hh = jax.random.uniform(ks[2], (4 * hidden, hidden), jnp.float32, -s, s)
    b_ih = jax.random.uniform(ks[3], (4 * hidden,), jnp.float32, -s, s)
    b_hh = jax.random.uniform(ks[4], (4 * hidden,), jnp.float32, -s, s)
    w_lin = jax.random.uniform(ks[5], (output_size, hidden), jnp.float32, -s, s)
    b_lin = jax.random.uniform(ks[6], (output_size,), jnp.float32, -s, s)

    params = prepare_params(w_ih, w_hh, b_ih, b_hh, w_lin, b_lin)

    pred = lstm_model_forward(x, params, output_size)
    pred = jax.block_until_ready(pred)

    ref = reference_forward(x, w_ih, w_hh, b_ih, b_hh, w_lin, b_lin)
    assert pred.shape == (output_size,)
    # bf16 MXU operands with f32 accumulation -> loosened tolerance vs f32 ref.
    assert jnp.allclose(pred, ref, rtol=2e-2, atol=2e-2), (pred, ref)

    print("KERNEL_OK")
</pallas_src>

<mosaic_0001>
module attributes {stable_mosaic.version = 11 : i64} {
  func.func @lstm_last_pred_kernel(%arg0: memref<8x16xf32, #tpu.memory_space<vmem>>, %arg1: memref<16x512xbf16, #tpu.memory_space<vmem>>, %arg2: memref<128x512xbf16, #tpu.memory_space<vmem>>, %arg3: memref<1x512xf32, #tpu.memory_space<vmem>>, %arg4: memref<128x128xbf16, #tpu.memory_space<vmem>>, %arg5: memref<1x128xf32, #tpu.memory_space<vmem>>, %arg6: memref<1x128xf32, #tpu.memory_space<vmem>>) attributes {dimension_semantics = [], scalar_prefetch = 0 : i64, scratch_operands = 0 : i64, tpu.core_type = #tpu.core_type<tc>} {
    %c0 = arith.constant 0 : index
    %c0_0 = arith.constant 0 : index
    %0 = vector.load %arg0[%c0, %c0_0] : memref<8x16xf32, #tpu.memory_space<vmem>>, vector<8x16xf32>
    %1 = arith.truncf %0 : vector<8x16xf32> to vector<8x16xbf16>
    %c0_1 = arith.constant 0 : index
    %c0_2 = arith.constant 0 : index
    %2 = vector.load %arg1[%c0_1, %c0_2] : memref<16x512xbf16, #tpu.memory_space<vmem>>, vector<16x512xbf16>
    %cst = arith.constant dense<0.000000e+00> : vector<8x512xf32>
    %3 = tpu.matmul %1, %2, %cst {dimension_numbers = #tpu.dot_dimension_numbers<[1], [0], [0], [1], [0, 0, 1, 1], [], []>} : vector<8x16xbf16>, vector<16x512xbf16>, vector<8x512xf32> -> vector<8x512xf32>
    %c0_3 = arith.constant 0 : index
    %c0_4 = arith.constant 0 : index
    %4 = vector.load %arg3[%c0_3, %c0_4] : memref<1x512xf32, #tpu.memory_space<vmem>>, vector<1x512xf32>
    %5 = vector.broadcast %4 : vector<1x512xf32> to vector<8x512xf32>
    %6 = arith.addf %3, %5 : vector<8x512xf32>
    %cst_5 = arith.constant 0.000000e+00 : bf16
    %7 = vector.broadcast %cst_5 : bf16 to vector<1x128xbf16>
    %cst_6 = arith.constant 0.000000e+00 : f32
    %8 = vector.broadcast %cst_6 : f32 to vector<1x128xf32>
    %9 = vector.extract_strided_slice %6 {offsets = [0, 0], sizes = [1, 512], strides = [1, 1]} : vector<8x512xf32> to vector<1x512xf32>
    %c0_7 = arith.constant 0 : index
    %c0_8 = arith.constant 0 : index
    %10 = vector.load %arg2[%c0_7, %c0_8] : memref<128x512xbf16, #tpu.memory_space<vmem>>, vector<128x512xbf16>
    %cst_9 = arith.constant dense<0.000000e+00> : vector<1x512xf32>
    %11 = tpu.matmul %7, %10, %cst_9 {dimension_numbers = #tpu.dot_dimension_numbers<[1], [0], [0], [1], [0, 0, 1, 1], [], []>} : vector<1x128xbf16>, vector<128x512xbf16>, vector<1x512xf32> -> vector<1x512xf32>
    %12 = arith.addf %9, %11 : vector<1x512xf32>
    %13 = vector.extract_strided_slice %12 {offsets = [0, 0], sizes = [1, 384], strides = [1, 1]} : vector<1x512xf32> to vector<1x384xf32>
    %14 = arith.negf %13 : vector<1x384xf32>
    %15 = math.exp %14 : vector<1x384xf32>
    %cst_10 = arith.constant 1.000000e+00 : f32
    %16 = vector.broadcast %cst_10 : f32 to vector<1x384xf32>
    %17 = arith.addf %16, %15 : vector<1x384xf32>
    %18 = arith.divf %16, %17 : vector<1x384xf32>
    %19 = vector.extract_strided_slice %12 {offsets = [0, 384], sizes = [1, 128], strides = [1, 1]} : vector<1x512xf32> to vector<1x128xf32>
    %20 = math.tanh %19 : vector<1x128xf32>
    %21 = vector.extract_strided_slice %18 {offsets = [0, 0], sizes = [1, 128], strides = [1, 1]} : vector<1x384xf32> to vector<1x128xf32>
    %22 = vector.extract_strided_slice %18 {offsets = [0, 128], sizes = [1, 128], strides = [1, 1]} : vector<1x384xf32> to vector<1x128xf32>
    %23 = vector.extract_strided_slice %18 {offsets = [0, 256], sizes = [1, 128], strides = [1, 1]} : vector<1x384xf32> to vector<1x128xf32>
    %24 = arith.mulf %22, %8 : vector<1x128xf32>
    %25 = arith.mulf %21, %20 : vector<1x128xf32>
    %26 = arith.addf %24, %25 : vector<1x128xf32>
    %27 = math.tanh %26 : vector<1x128xf32>
    %28 = arith.mulf %23, %27 : vector<1x128xf32>
    %29 = arith.truncf %28 : vector<1x128xf32> to vector<1x128xbf16>
    %30 = vector.extract_strided_slice %6 {offsets = [1, 0], sizes = [1, 512], strides = [1, 1]} : vector<8x512xf32> to vector<1x512xf32>
    %c0_11 = arith.constant 0 : index
    %c0_12 = arith.constant 0 : index
    %31 = vector.load %arg2[%c0_11, %c0_12] : memref<128x512xbf16, #tpu.memory_space<vmem>>, vector<128x512xbf16>
    %cst_13 = arith.constant dense<0.000000e+00> : vector<1x512xf32>
    %32 = tpu.matmul %29, %31, %cst_13 {dimension_numbers = #tpu.dot_dimension_numbers<[1], [0], [0], [1], [0, 0, 1, 1], [], []>} : vector<1x128xbf16>, vector<128x512xbf16>, vector<1x512xf32> -> vector<1x512xf32>
    %33 = arith.addf %30, %32 : vector<1x512xf32>
    %34 = vector.extract_strided_slice %33 {offsets = [0, 0], sizes = [1, 384], strides = [1, 1]} : vector<1x512xf32> to vector<1x384xf32>
    %35 = arith.negf %34 : vector<1x384xf32>
    %36 = math.exp %35 : vector<1x384xf32>
    %cst_14 = arith.constant 1.000000e+00 : f32
    %37 = vector.broadcast %cst_14 : f32 to vector<1x384xf32>
    %38 = arith.addf %37, %36 : vector<1x384xf32>
    %39 = arith.divf %37, %38 : vector<1x384xf32>
    %40 = vector.extract_strided_slice %33 {offsets = [0, 384], sizes = [1, 128], strides = [1, 1]} : vector<1x512xf32> to vector<1x128xf32>
    %41 = math.tanh %40 : vector<1x128xf32>
    %42 = vector.extract_strided_slice %39 {offsets = [0, 0], sizes = [1, 128], strides = [1, 1]} : vector<1x384xf32> to vector<1x128xf32>
    %43 = vector.extract_strided_slice %39 {offsets = [0, 128], sizes = [1, 128], strides = [1, 1]} : vector<1x384xf32> to vector<1x128xf32>
    %44 = vector.extract_strided_slice %39 {offsets = [0, 256], sizes = [1, 128], strides = [1, 1]} : vector<1x384xf32> to vector<1x128xf32>
    %45 = arith.mulf %43, %26 : vector<1x128xf32>
    %46 = arith.mulf %42, %41 : vector<1x128xf32>
    %47 = arith.addf %45, %46 : vector<1x128xf32>
    %48 = math.tanh %47 : vector<1x128xf32>
    %49 = arith.mulf %44, %48 : vector<1x128xf32>
    %50 = arith.truncf %49 : vector<1x128xf32> to vector<1x128xbf16>
    %51 = vector.extract_strided_slice %6 {offsets = [2, 0], sizes = [1, 512], strides = [1, 1]} : vector<8x512xf32> to vector<1x512xf32>
    %c0_15 = arith.constant 0 : index
    %c0_16 = arith.constant 0 : index
    %52 = vector.load %arg2[%c0_15, %c0_16] : memref<128x512xbf16, #tpu.memory_space<vmem>>, vector<128x512xbf16>
    %cst_17 = arith.constant dense<0.000000e+00> : vector<1x512xf32>
    %53 = tpu.matmul %50, %52, %cst_17 {dimension_numbers = #tpu.dot_dimension_numbers<[1], [0], [0], [1], [0, 0, 1, 1], [], []>} : vector<1x128xbf16>, vector<128x512xbf16>, vector<1x512xf32> -> vector<1x512xf32>
    %54 = arith.addf %51, %53 : vector<1x512xf32>
    %55 = vector.extract_strided_slice %54 {offsets = [0, 0], sizes = [1, 384], strides = [1, 1]} : vector<1x512xf32> to vector<1x384xf32>
    %56 = arith.negf %55 : vector<1x384xf32>
    %57 = math.exp %56 : vector<1x384xf32>
    %cst_18 = arith.constant 1.000000e+00 : f32
    %58 = vector.broadcast %cst_18 : f32 to vector<1x384xf32>
    %59 = arith.addf %58, %57 : vector<1x384xf32>
    %60 = arith.divf %58, %59 : vector<1x384xf32>
    %61 = vector.extract_strided_slice %54 {offsets = [0, 384], sizes = [1, 128], strides = [1, 1]} : vector<1x512xf32> to vector<1x128xf32>
    %62 = math.tanh %61 : vector<1x128xf32>
    %63 = vector.extract_strided_slice %60 {offsets = [0, 0], sizes = [1, 128], strides = [1, 1]} : vector<1x384xf32> to vector<1x128xf32>
    %64 = vector.extract_strided_slice %60 {offsets = [0, 128], sizes = [1, 128], strides = [1, 1]} : vector<1x384xf32> to vector<1x128xf32>
    %65 = vector.extract_strided_slice %60 {offsets = [0, 256], sizes = [1, 128], strides = [1, 1]} : vector<1x384xf32> to vector<1x128xf32>
    %66 = arith.mulf %64, %47 : vector<1x128xf32>
    %67 = arith.mulf %63, %62 : vector<1x128xf32>
    %68 = arith.addf %66, %67 : vector<1x128xf32>
    %69 = math.tanh %68 : vector<1x128xf32>
    %70 = arith.mulf %65, %69 : vector<1x128xf32>
    %71 = arith.truncf %70 : vector<1x128xf32> to vector<1x128xbf16>
    %72 = vector.extract_strided_slice %6 {offsets = [3, 0], sizes = [1, 512], strides = [1, 1]} : vector<8x512xf32> to vector<1x512xf32>
    %c0_19 = arith.constant 0 : index
    %c0_20 = arith.constant 0 : index
    %73 = vector.load %arg2[%c0_19, %c0_20] : memref<128x512xbf16, #tpu.memory_space<vmem>>, vector<128x512xbf16>
    %cst_21 = arith.constant dense<0.000000e+00> : vector<1x512xf32>
    %74 = tpu.matmul %71, %73, %cst_21 {dimension_numbers = #tpu.dot_dimension_numbers<[1], [0], [0], [1], [0, 0, 1, 1], [], []>} : vector<1x128xbf16>, vector<128x512xbf16>, vector<1x512xf32> -> vector<1x512xf32>
    %75 = arith.addf %72, %74 : vector<1x512xf32>
    %76 = vector.extract_strided_slice %75 {offsets = [0, 0], sizes = [1, 384], strides = [1, 1]} : vector<1x512xf32> to vector<1x384xf32>
    %77 = arith.negf %76 : vector<1x384xf32>
    %78 = math.exp %77 : vector<1x384xf32>
    %cst_22 = arith.constant 1.000000e+00 : f32
    %79 = vector.broadcast %cst_22 : f32 to vector<1x384xf32>
    %80 = arith.addf %79, %78 : vector<1x384xf32>
    %81 = arith.divf %79, %80 : vector<1x384xf32>
    %82 = vector.extract_strided_slice %75 {offsets = [0, 384], sizes = [1, 128], strides = [1, 1]} : vector<1x512xf32> to vector<1x128xf32>
    %83 = math.tanh %82 : vector<1x128xf32>
    %84 = vector.extract_strided_slice %81 {offsets = [0, 0], sizes = [1, 128], strides = [1, 1]} : vector<1x384xf32> to vector<1x128xf32>
    %85 = vector.extract_strided_slice %81 {offsets = [0, 128], sizes = [1, 128], strides = [1, 1]} : vector<1x384xf32> to vector<1x128xf32>
    %86 = vector.extract_strided_slice %81 {offsets = [0, 256], sizes = [1, 128], strides = [1, 1]} : vector<1x384xf32> to vector<1x128xf32>
    %87 = arith.mulf %85, %68 : vector<1x128xf32>
    %88 = arith.mulf %84, %83 : vector<1x128xf32>
    %89 = arith.addf %87, %88 : vector<1x128xf32>
    %90 = math.tanh %89 : vector<1x128xf32>
    %91 = arith.mulf %86, %90 : vector<1x128xf32>
    %92 = arith.truncf %91 : vector<1x128xf32> to vector<1x128xbf16>
    %93 = vector.extract_strided_slice %6 {offsets = [4, 0], sizes = [1, 512], strides = [1, 1]} : vector<8x512xf32> to vector<1x512xf32>
    %c0_23 = arith.constant 0 : index
    %c0_24 = arith.constant 0 : index
    %94 = vector.load %arg2[%c0_23, %c0_24] : memref<128x512xbf16, #tpu.memory_space<vmem>>, vector<128x512xbf16>
    %cst_25 = arith.constant dense<0.000000e+00> : vector<1x512xf32>
    %95 = tpu.matmul %92, %94, %cst_25 {dimension_numbers = #tpu.dot_dimension_numbers<[1], [0], [0], [1], [0, 0, 1, 1], [], []>} : vector<1x128xbf16>, vector<128x512xbf16>, vector<1x512xf32> -> vector<1x512xf32>
    %96 = arith.addf %93, %95 : vector<1x512xf32>
    %97 = vector.extract_strided_slice %96 {offsets = [0, 0], sizes = [1, 384], strides = [1, 1]} : vector<1x512xf32> to vector<1x384xf32>
    %98 = arith.negf %97 : vector<1x384xf32>
    %99 = math.exp %98 : vector<1x384xf32>
    %cst_26 = arith.constant 1.000000e+00 : f32
    %100 = vector.broadcast %cst_26 : f32 to vector<1x384xf32>
    %101 = arith.addf %100, %99 : vector<1x384xf32>
    %102 = arith.divf %100, %101 : vector<1x384xf32>
    %103 = vector.extract_strided_slice %96 {offsets = [0, 384], sizes = [1, 128], strides = [1, 1]} : vector<1x512xf32> to vector<1x128xf32>
    %104 = math.tanh %103 : vector<1x128xf32>
    %105 = vector.extract_strided_slice %102 {offsets = [0, 0], sizes = [1, 128], strides = [1, 1]} : vector<1x384xf32> to vector<1x128xf32>
    %106 = vector.extract_strided_slice %102 {offsets = [0, 128], sizes = [1, 128], strides = [1, 1]} : vector<1x384xf32> to vector<1x128xf32>
    %107 = vector.extract_strided_slice %102 {offsets = [0, 256], sizes = [1, 128], strides = [1, 1]} : vector<1x384xf32> to vector<1x128xf32>
    %108 = arith.mulf %106, %89 : vector<1x128xf32>
    %109 = arith.mulf %105, %104 : vector<1x128xf32>
    %110 = arith.addf %108, %109 : vector<1x128xf32>
    %111 = math.tanh %110 : vector<1x128xf32>
    %112 = arith.mulf %107, %111 : vector<1x128xf32>
    %113 = arith.truncf %112 : vector<1x128xf32> to vector<1x128xbf16>
    %114 = vector.extract_strided_slice %6 {offsets = [5, 0], sizes = [1, 512], strides = [1, 1]} : vector<8x512xf32> to vector<1x512xf32>
    %c0_27 = arith.constant 0 : index
    %c0_28 = arith.constant 0 : index
    %115 = vector.load %arg2[%c0_27, %c0_28] : memref<128x512xbf16, #tpu.memory_space<vmem>>, vector<128x512xbf16>
    %cst_29 = arith.constant dense<0.000000e+00> : vector<1x512xf32>
    %116 = tpu.matmul %113, %115, %cst_29 {dimension_numbers = #tpu.dot_dimension_numbers<[1], [0], [0], [1], [0, 0, 1, 1], [], []>} : vector<1x128xbf16>, vector<128x512xbf16>, vector<1x512xf32> -> vector<1x512xf32>
    %117 = arith.addf %114, %116 : vector<1x512xf32>
    %118 = vector.extract_strided_slice %117 {offsets = [0, 0], sizes = [1, 384], strides = [1, 1]} : vector<1x512xf32> to vector<1x384xf32>
    %119 = arith.negf %118 : vector<1x384xf32>
    %120 = math.exp %119 : vector<1x384xf32>
    %cst_30 = arith.constant 1.000000e+00 : f32
    %121 = vector.broadcast %cst_30 : f32 to vector<1x384xf32>
    %122 = arith.addf %121, %120 : vector<1x384xf32>
    %123 = arith.divf %121, %122 : vector<1x384xf32>
    %124 = vector.extract_strided_slice %117 {offsets = [0, 384], sizes = [1, 128], strides = [1, 1]} : vector<1x512xf32> to vector<1x128xf32>
    %125 = math.tanh %124 : vector<1x128xf32>
    %126 = vector.extract_strided_slice %123 {offsets = [0, 0], sizes = [1, 128], strides = [1, 1]} : vector<1x384xf32> to vector<1x128xf32>
    %127 = vector.extract_strided_slice %123 {offsets = [0, 128], sizes = [1, 128], strides = [1, 1]} : vector<1x384xf32> to vector<1x128xf32>
    %128 = vector.extract_strided_slice %123 {offsets = [0, 256], sizes = [1, 128], strides = [1, 1]} : vector<1x384xf32> to vector<1x128xf32>
    %129 = arith.mulf %127, %110 : vector<1x128xf32>
    %130 = arith.mulf %126, %125 : vector<1x128xf32>
    %131 = arith.addf %129, %130 : vector<1x128xf32>
    %132 = math.tanh %131 : vector<1x128xf32>
    %133 = arith.mulf %128, %132 : vector<1x128xf32>
    %134 = arith.truncf %133 : vector<1x128xf32> to vector<1x128xbf16>
    %135 = vector.extract_strided_slice %6 {offsets = [6, 0], sizes = [1, 512], strides = [1, 1]} : vector<8x512xf32> to vector<1x512xf32>
    %c0_31 = arith.constant 0 : index
    %c0_32 = arith.constant 0 : index
    %136 = vector.load %arg2[%c0_31, %c0_32] : memref<128x512xbf16, #tpu.memory_space<vmem>>, vector<128x512xbf16>
    %cst_33 = arith.constant dense<0.000000e+00> : vector<1x512xf32>
    %137 = tpu.matmul %134, %136, %cst_33 {dimension_numbers = #tpu.dot_dimension_numbers<[1], [0], [0], [1], [0, 0, 1, 1], [], []>} : vector<1x128xbf16>, vector<128x512xbf16>, vector<1x512xf32> -> vector<1x512xf32>
    %138 = arith.addf %135, %137 : vector<1x512xf32>
    %139 = vector.extract_strided_slice %138 {offsets = [0, 0], sizes = [1, 384], strides = [1, 1]} : vector<1x512xf32> to vector<1x384xf32>
    %140 = arith.negf %139 : vector<1x384xf32>
    %141 = math.exp %140 : vector<1x384xf32>
    %cst_34 = arith.constant 1.000000e+00 : f32
    %142 = vector.broadcast %cst_34 : f32 to vector<1x384xf32>
    %143 = arith.addf %142, %141 : vector<1x384xf32>
    %144 = arith.divf %142, %143 : vector<1x384xf32>
    %145 = vector.extract_strided_slice %138 {offsets = [0, 384], sizes = [1, 128], strides = [1, 1]} : vector<1x512xf32> to vector<1x128xf32>
    %146 = math.tanh %145 : vector<1x128xf32>
    %147 = vector.extract_strided_slice %144 {offsets = [0, 0], sizes = [1, 128], strides = [1, 1]} : vector<1x384xf32> to vector<1x128xf32>
    %148 = vector.extract_strided_slice %144 {offsets = [0, 128], sizes = [1, 128], strides = [1, 1]} : vector<1x384xf32> to vector<1x128xf32>
    %149 = vector.extract_strided_slice %144 {offsets = [0, 256], sizes = [1, 128], strides = [1, 1]} : vector<1x384xf32> to vector<1x128xf32>
    %150 = arith.mulf %148, %131 : vector<1x128xf32>
    %151 = arith.mulf %147, %146 : vector<1x128xf32>
    %152 = arith.addf %150, %151 : vector<1x128xf32>
    %153 = math.tanh %152 : vector<1x128xf32>
    %154 = arith.mulf %149, %153 : vector<1x128xf32>
    %155 = arith.truncf %154 : vector<1x128xf32> to vector<1x128xbf16>
    %156 = vector.extract_strided_slice %6 {offsets = [7, 0], sizes = [1, 512], strides = [1, 1]} : vector<8x512xf32> to vector<1x512xf32>
    %c0_35 = arith.constant 0 : index
    %c0_36 = arith.constant 0 : index
    %157 = vector.load %arg2[%c0_35, %c0_36] : memref<128x512xbf16, #tpu.memory_space<vmem>>, vector<128x512xbf16>
    %cst_37 = arith.constant dense<0.000000e+00> : vector<1x512xf32>
    %158 = tpu.matmul %155, %157, %cst_37 {dimension_numbers = #tpu.dot_dimension_numbers<[1], [0], [0], [1], [0, 0, 1, 1], [], []>} : vector<1x128xbf16>, vector<128x512xbf16>, vector<1x512xf32> -> vector<1x512xf32>
    %159 = arith.addf %156, %158 : vector<1x512xf32>
    %160 = vector.extract_strided_slice %159 {offsets = [0, 0], sizes = [1, 384], strides = [1, 1]} : vector<1x512xf32> to vector<1x384xf32>
    %161 = arith.negf %160 : vector<1x384xf32>
    %162 = math.exp %161 : vector<1x384xf32>
    %cst_38 = arith.constant 1.000000e+00 : f32
    %163 = vector.broadcast %cst_38 : f32 to vector<1x384xf32>
    %164 = arith.addf %163, %162 : vector<1x384xf32>
    %165 = arith.divf %163, %164 : vector<1x384xf32>
    %166 = vector.extract_strided_slice %159 {offsets = [0, 384], sizes = [1, 128], strides = [1, 1]} : vector<1x512xf32> to vector<1x128xf32>
    %167 = math.tanh %166 : vector<1x128xf32>
    %168 = vector.extract_strided_slice %165 {offsets = [0, 0], sizes = [1, 128], strides = [1, 1]} : vector<1x384xf32> to vector<1x128xf32>
    %169 = vector.extract_strided_slice %165 {offsets = [0, 128], sizes = [1, 128], strides = [1, 1]} : vector<1x384xf32> to vector<1x128xf32>
    %170 = vector.extract_strided_slice %165 {offsets = [0, 256], sizes = [1, 128], strides = [1, 1]} : vector<1x384xf32> to vector<1x128xf32>
    %171 = arith.mulf %169, %152 : vector<1x128xf32>
    %172 = arith.mulf %168, %167 : vector<1x128xf32>
    %173 = arith.addf %171, %172 : vector<1x128xf32>
    %174 = math.tanh %173 : vector<1x128xf32>
    %175 = arith.mulf %170, %174 : vector<1x128xf32>
    %176 = arith.truncf %175 : vector<1x128xf32> to vector<1x128xbf16>
    %c0_39 = arith.constant 0 : index
    %c0_40 = arith.constant 0 : index
    %177 = vector.load %arg4[%c0_39, %c0_40] : memref<128x128xbf16, #tpu.memory_space<vmem>>, vector<128x128xbf16>
    %cst_41 = arith.constant dense<0.000000e+00> : vector<1x128xf32>
    %178 = tpu.matmul %176, %177, %cst_41 {dimension_numbers = #tpu.dot_dimension_numbers<[1], [0], [0], [1], [0, 0, 1, 1], [], []>} : vector<1x128xbf16>, vector<128x128xbf16>, vector<1x128xf32> -> vector<1x128xf32>
    %c0_42 = arith.constant 0 : index
    %c0_43 = arith.constant 0 : index
    %179 = vector.load %arg5[%c0_42, %c0_43] : memref<1x128xf32, #tpu.memory_space<vmem>>, vector<1x128xf32>
    %180 = arith.addf %178, %179 : vector<1x128xf32>
    %c0_44 = arith.constant 0 : index
    %c0_45 = arith.constant 0 : index
    %181 = vector.load %arg6[%c0_44, %c0_45] : memref<1x128xf32, #tpu.memory_space<vmem>>, vector<1x128xf32>
    tpu.vector_store %arg6[%c0_44, %c0_45], %180 {strides = array<i32>} : memref<1x128xf32, #tpu.memory_space<vmem>>, vector<1x128xf32>,
    return
  }
}

</mosaic_0001>

<bundles_post_ra>
// kernel: tpu_custom_call.1
= control target key start
LH: loop header
LB: loop body
LE: loop exit
PB: predicated region body
PF: predicated region fallthrough
CT: control target
= control target key end

     0   :  { %11 = vsyncpa [#allocation3], 0  ;;  %s2578_s0 = inlined_call_operand.hbm [shape: f32[8,16], index: 0, kind: input, shape index: {}]   ;;  %s2579_s1 = inlined_call_operand.hbm [shape: bf16[16,512], index: 1, kind: input, shape index: {}]   ;;  %s2580_s2 = inlined_call_operand.hbm [shape: bf16[128,512], index: 2, kind: input, shape index: {}]   ;;  %s2581_s3 = inlined_call_operand.hbm [shape: f32[1,512], index: 3, kind: input, shape index: {}]   ;;  %s2582_s4 = inlined_call_operand.hbm [shape: bf16[128,128], index: 4, kind: input, shape index: {}]   ;;  %s2583_s5 = inlined_call_operand.vmem [shape: f32[1,128], index: 5, kind: input, shape index: {}]   ;;  %s2584_s6 = inlined_call_operand.hbm [shape: f32[1,128], index: 6, kind: output, shape index: {}]  }
   0x1   :  { %12 = vsyncpa [#allocation6], 0 }
   0x2   :  { %13 = vsyncpa [#allocation9], 0  ;;  %s30_s23 = sshll.u32 %s2579_s1, 4  ;;  %s31_s23 = int_to_ptr.hbm [resolvable:$true] %s30_s23 }
   0x3   :  { %14 = vsyncpa [#allocation4], 0  ;;  %s2113_s24 = smov [#allocation5]   ;;  %s57_s28 = sshll.u32 %s2581_s3, 4  ;;  %s58_s28 = int_to_ptr.hbm [resolvable:$true] %s57_s28 }
   0x4   :  { %s32_s25 = sshll.u32 %s2113_s24, 4  ;;  %s2114_s29 = smov 256   ;;  %s33_s25 = int_to_ptr.vmem [resolvable:$true] %s32_s25 }
   0x5   :  { %s2115_s30 = smov 16   ;;  %s2116_s7 = smov [#allocation8]  }
   0x6   :  { %38 = dma.hbm_to_vmem [thread:$0]  %s31_s23, 512, %s33_s25, [#allocation6], %s2114_s29, %s2114_s29, %s2115_s30  }
   0x7   :  { %s59_s8 = sshll.u32 %s2116_s7, 4  ;;  %s20_s11 = sshll.u32 %s2578_s0, 4  ;;  %s60_s8 = int_to_ptr.vmem [resolvable:$true] %s59_s8  ;;  %s21_s11 = int_to_ptr.hbm [resolvable:$true] %s20_s11 }
   0x8   :  { %62 = dma.hbm_to_vmem [thread:$0]  %s58_s28, 64, %s60_s8, [#allocation9]  }
   0x9   :  { %s43_s13 = sshll.u32 %s2580_s2, 4  ;;  %s2117_s14 = smov [#allocation2]   ;;  %s44_s13 = int_to_ptr.hbm [resolvable:$true] %s43_s13 }
   0xa   :  { %s22_s15 = sshll.u32 %s2117_s14, 4  ;;  %s2118_s3 = smov [#allocation7]   ;;  %s23_s15 = int_to_ptr.vmem [resolvable:$true] %s22_s15 }
   0xb   :  { %25 = dma.hbm_to_vmem [thread:$0]  %s21_s11, 128, %s23_s15, [#allocation3]  }
   0xc   :  { %s45_s16 = sshll.u32 %s2118_s3, 4  ;;  %s67_s19 = sshll.u32 %s2582_s4, 4  ;;  %s46_s16 = int_to_ptr.vmem [resolvable:$true] %s45_s16  ;;  %s68_s19 = int_to_ptr.hbm [resolvable:$true] %s67_s19 }
   0xd   :  { %51 = dma.hbm_to_vmem [thread:$0]  %s44_s13, 4096, %s46_s16, [#allocation6], %s2114_s29, %s2114_s29, %s2115_s30  }
   0xe   :  { %s2119_s0 = smov [#allocation10]   ;;  %s2120_s21 = smov 64  }
   0xf   :  { %s69_s20 = sshll.u32 %s2119_s0, 4  ;;  %s2121_s22 = smov 4   ;;  %s70_s20 = int_to_ptr.vmem [resolvable:$true] %s69_s20 }
  0x10   :  { %75 = dma.hbm_to_vmem [thread:$0]  %s68_s19, 1024, %s70_s20, [#allocation9], %s2120_s21, %s2120_s21, %s2121_s22  }
  0x11   :  { %2105 = dma.done.wait [#allocation3], 128  }
  0x12   :  { %2106 = vsyncadd [#allocation3], 4294967168 }
  0x13   :  { %2107 = dma.done.wait [#allocation6], 4608  }
  0x14   :  { %2108 = vsyncadd [#allocation6], 4294962688 }
  0x15   :  { %2109 = dma.done.wait [#allocation9], 1088  }
  0x16   :  { %2110 = vsyncadd [#allocation9], 4294966208  ;;  %v1576_v0 = vld [vmem:[#allocation5] sm:$0xf]  ;;  %v1780_v1 = vld [vmem:[#allocation5 + $0xc] sm:$0xf0] }
  0x17   :  { %v1584_v2 = vld [vmem:[#allocation5 + $0x8] sm:$0xf]  ;;  %v1577_v3 = vor.u32 %v1780_v1, %v1576_v0  ;;  %v1781_v4 = vld [vmem:[#allocation5 + $0x14] sm:$0xf0]  ;;  %v1708_v5 = vld [vmem:[#allocation7 + $0xe0] sm:$0xf] }
  0x18   :  { %v1812_v6 = vld [vmem:[#allocation7 + $0xec] sm:$0xf0]  ;;  %v1585_v7 = vor.u32 %v1781_v4, %v1584_v2  ;;  %v1716_v9 = vld [vmem:[#allocation7 + $0xe8] sm:$0xf]  ;;  %v1813_v10 = vld [vmem:[#allocation7 + $0xf4] sm:$0xf0] }
  0x19   :  { %v2174_v8 = vor.u32 %v1812_v6, %v1708_v5  ;;  %v99_v11 = vld [vmem:[#allocation2] sm:$0xff]  ;;  %vm135_vm0 = vcmask 130048   ;;  %146 = vmatpush.bf16.msra.mxu1 %v1577_v3  ;;  %v2176_v12 = vor.u32 %v1813_v10, %v1716_v9  ;;  %v1778_v14 = vld [vmem:[#allocation5 + $0x4] sm:$0xf]  ;;  %v1578_v15 = vld [vmem:[#allocation5 + $0x10] sm:$0xf0] }
  0x1a   :  { %v2178_v13 = vpack.c.bf16 %v99_v11, %v99_v11  ;;  %v1779_v16 = vld [vmem:[#allocation5 + $0xc] sm:$0xf]  ;;  %172 = vmatpush.bf16.msra.mxu2 %v1585_v7  ;;  %v1581_v17 = vor.u32 %v1778_v14, %v1578_v15  ;;  %v1586_v18 = vld [vmem:[#allocation5 + $0x18] sm:$0xf0]  ;;  %v1692_v19 = vld [vmem:[#allocation7 + $0xc0] sm:$0xf] }
  0x1b   :  { %383 = vmatpush.bf16.msra.mxu0 %v2174_v8  ;;  %v1808_v20 = vld [vmem:[#allocation7 + $0xcc] sm:$0xf0]  ;;  %v1589_v21 = vor.u32 %v1779_v16, %v1586_v18  ;;  %v1810_v23 = vld [vmem:[#allocation7 + $0xe4] sm:$0xf]  ;;  %v1710_v24 = vld [vmem:[#allocation7 + $0xf0] sm:$0xf0] }
  0x1c   :  { %v2182_v22 = vor.u32 %v1808_v20, %v1692_v19  ;;  %v1700_v25 = vld [vmem:[#allocation7 + $0xc8] sm:$0xf]  ;;  %1590 = vmatmul.msk.bf16.vlgmr.msra.gmra.mxu1 %vm135_vm0, %v2178_v13  ;;  %v2186_v26 = vor.u32 %v1810_v23, %v1710_v24  ;;  %v1809_v27 = vld [vmem:[#allocation7 + $0xd4] sm:$0xf0]  ;;  %v1811_v28 = vld [vmem:[#allocation7 + $0xec] sm:$0xf] }
  0x1d   :  { %v1718_v29 = vld [vmem:[#allocation7 + $0xf8] sm:$0xf0]  ;;  %159 = vmatpush.bf16.msrb.mxu1 %v1581_v17  ;;  %185 = vmatpush.bf16.msra.mxu3 %v1589_v21  ;;  %v2188_v30 = vor.u32 %v1809_v27, %v1700_v25  ;;  %v1676_v32 = vld [vmem:[#allocation7 + $0xa0] sm:$0xf]  ;;  %v1804_v33 = vld [vmem:[#allocation7 + $0xac] sm:$0xf0] }
  0x1e   :  { %409 = vmatpush.bf16.msrb.mxu2 %v2176_v12  ;;  %v2190_v31 = vor.u32 %v1811_v28, %v1718_v29  ;;  %v1806_v34 = vld [vmem:[#allocation7 + $0xc4] sm:$0xf]  ;;  %v2194_v35 = vor.u32 %v1804_v33, %v1676_v32  ;;  %v1694_v36 = vld [vmem:[#allocation7 + $0xd0] sm:$0xf0]  ;;  %v1684_v37 = vld [vmem:[#allocation7 + $0xa8] sm:$0xf] }
  0x1f   :  { %384 = vmatpush.bf16.msra.mxu0 %v2182_v22  ;;  %v1805_v38 = vld [vmem:[#allocation7 + $0xb4] sm:$0xf0]  ;;  %v2198_v39 = vor.u32 %v1806_v34, %v1694_v36  ;;  %v1807_v41 = vld [vmem:[#allocation7 + $0xcc] sm:$0xf]  ;;  %v1702_v42 = vld [vmem:[#allocation7 + $0xd8] sm:$0xf0]  ;;  %1592 = vmatmul.msk.bf16.vlgmr.msra.gmra.mxu2 %vm135_vm0, %v2178_v13 }
  0x20   :  { %v2200_v40 = vor.u32 %v1805_v38, %v1684_v37  ;;  %v1660_v43 = vld [vmem:[#allocation7 + $0x80] sm:$0xf]  ;;  %v2202_v44 = vor.u32 %v1807_v41, %v1702_v42  ;;  %v1800_v45 = vld [vmem:[#allocation7 + $0x8c] sm:$0xf0]  ;;  %v1802_v46 = vld [vmem:[#allocation7 + $0xa4] sm:$0xf]  ;;  %1593 = vmatmul.msk.bf16.vlgmr.msra.gmra.mxu3 %vm135_vm0, %v2178_v13 }
  0x21   :  { %396 = vmatpush.bf16.msra.mxu1 %v2186_v26  ;;  %422 = vmatpush.bf16.msrb.mxu3 %v2190_v31  ;;  %v1678_v47 = vld [vmem:[#allocation7 + $0xb0] sm:$0xf0]  ;;  %v1668_v48 = vld [vmem:[#allocation7 + $0x88] sm:$0xf]  ;;  %v1801_v49 = vld [vmem:[#allocation7 + $0x94] sm:$0xf0]  ;;  %v2210_v51 = vor.u32 %v1800_v45, %v1660_v43 }
  0x22   :  { %410 = vmatpush.bf16.msrb.mxu2 %v2188_v30  ;;  %v1803_v50 = vld [vmem:[#allocation7 + $0xac] sm:$0xf]  ;;  %v2212_v52 = vor.u32 %v1802_v46, %v1678_v47  ;;  %v1686_v53 = vld [vmem:[#allocation7 + $0xb8] sm:$0xf0]  ;;  %v1644_v54 = vld [vmem:[#allocation7 + $0x60] sm:$0xf]  ;;  %v2216_v56 = vor.u32 %v1801_v49, %v1668_v48 }
  0x23   :  { %385 = vmatpush.bf16.msra.mxu0 %v2194_v35  ;;  %v1796_v55 = vld [vmem:[#allocation7 + $0x6c] sm:$0xf0]  ;;  %v2218_v57 = vor.u32 %v1803_v50, %v1686_v53  ;;  %v1798_v58 = vld [vmem:[#allocation7 + $0x84] sm:$0xf]  ;;  %v1662_v59 = vld [vmem:[#allocation7 + $0x90] sm:$0xf0] }
  0x24   :  { %v1652_v60 = vld [vmem:[#allocation7 + $0x68] sm:$0xf]  ;;  %v1797_v61 = vld [vmem:[#allocation7 + $0x74] sm:$0xf0]  ;;  %v1799_v62 = vld [vmem:[#allocation7 + $0x8c] sm:$0xf]  ;;  %v2222_v0 = vor.u32 %v1796_v55, %v1644_v54  ;;  %v2224_v1 = vor.u32 %v1798_v58, %v1662_v59 }
  0x25   :  { %397 = vmatpush.bf16.msra.mxu1 %v2198_v39  ;;  %423 = vmatpush.bf16.msrb.mxu3 %v2202_v44  ;;  %v1670_v63 = vld [vmem:[#allocation7 + $0x98] sm:$0xf0]  ;;  %v1628_v2 = vld [vmem:[#allocation7 + $0x40] sm:$0xf]  ;;  %v1792_v3 = vld [vmem:[#allocation7 + $0x4c] sm:$0xf0]  ;;  %v2228_v4 = vor.u32 %v1797_v61, %v1652_v60 }
  0x26   :  { %411 = vmatpush.bf16.msrb.mxu2 %v2200_v40  ;;  %v2230_v5 = vor.u32 %v1799_v62, %v1670_v63  ;;  %v1794_v6 = vld [vmem:[#allocation7 + $0x64] sm:$0xf]  ;;  %v1646_v7 = vld [vmem:[#allocation7 + $0x70] sm:$0xf0]  ;;  %v1636_v9 = vld [vmem:[#allocation7 + $0x48] sm:$0xf]  ;;  %v2234_v15 = vor.u32 %v1792_v3, %v1628_v2 }
  0x27   :  { %386 = vmatpush.bf16.msra.mxu0 %v2210_v51  ;;  %v1793_v10 = vld [vmem:[#allocation7 + $0x54] sm:$0xf0]  ;;  %v1795_v11 = vld [vmem:[#allocation7 + $0x6c] sm:$0xf]  ;;  %v1654_v14 = vld [vmem:[#allocation7 + $0x78] sm:$0xf0]  ;;  %v2236_v16 = vor.u32 %v1794_v6, %v1646_v7 }
  0x28   :  { %v1612_v17 = vld [vmem:[#allocation7 + $0x20] sm:$0xf]  ;;  %v1788_v18 = vld [vmem:[#allocation7 + $0x2c] sm:$0xf0]  ;;  %v2240_v19 = vor.u32 %v1793_v10, %v1636_v9  ;;  %v2242_v20 = vor.u32 %v1795_v11, %v1654_v14  ;;  %v1790_v21 = vld [vmem:[#allocation7 + $0x44] sm:$0xf] }
  0x29   :  { %398 = vmatpush.bf16.msra.mxu1 %v2212_v52  ;;  %424 = vmatpush.bf16.msrb.mxu3 %v2218_v57  ;;  %v1630_v23 = vld [vmem:[#allocation7 + $0x50] sm:$0xf0]  ;;  %v1620_v24 = vld [vmem:[#allocation7 + $0x28] sm:$0xf]  ;;  %v1789_v25 = vld [vmem:[#allocation7 + $0x34] sm:$0xf0]  ;;  %v2248_v29 = vor.u32 %v1788_v18, %v1612_v17 }
  0x2a   :  { %412 = vmatpush.bf16.msrb.mxu2 %v2216_v56  ;;  %v1791_v27 = vld [vmem:[#allocation7 + $0x4c] sm:$0xf]  ;;  %v1638_v28 = vld [vmem:[#allocation7 + $0x58] sm:$0xf0]  ;;  %v2250_v32 = vor.u32 %v1790_v21, %v1630_v23  ;;  %v1596_v33 = vld [vmem:[#allocation7] sm:$0xf]  ;;  %v2254_v36 = vor.u32 %v1789_v25, %v1620_v24 }
  0x2b   :  { %387 = vmatpush.bf16.msra.mxu0 %v2222_v0  ;;  %v1784_v34 = vld [vmem:[#allocation7 + $0xc] sm:$0xf0]  ;;  %v1786_v37 = vld [vmem:[#allocation7 + $0x24] sm:$0xf]  ;;  %v1614_v38 = vld [vmem:[#allocation7 + $0x30] sm:$0xf0] }
  0x2c   :  { %1591 = vmatmul.msk.bf16.vlgmr.msrb.gmra.mxu1 %vm135_vm0, %v2178_v13  ;;  %v2256_v13 = vor.u32 %v1791_v27, %v1638_v28  ;;  %v1604_v41 = vld [vmem:[#allocation7 + $0x8] sm:$0xf]  ;;  %v1785_v42 = vld [vmem:[#allocation7 + $0x14] sm:$0xf0]  ;;  %v1787_v43 = vld [vmem:[#allocation7 + $0x2c] sm:$0xf]  ;;  %v2260_v46 = vor.u32 %v1784_v34, %v1596_v33  ;;  %v2262_v47 = vor.u32 %v1786_v37, %v1614_v38 }
  0x2d   :  { %399 = vmatpush.bf16.msra.mxu1 %v2224_v1  ;;  %425 = vmatpush.bf16.msrb.mxu3 %v2230_v5  ;;  %v1622_v45 = vld [vmem:[#allocation7 + $0x38] sm:$0xf0]  ;;  %v2266_v48 = vor.u32 %v1785_v42, %v1604_v41  ;;  %v1782_v50 = vld [vmem:[#allocation7 + $0x4] sm:$0xf]  ;;  %v1598_v53 = vld [vmem:[#allocation7 + $0x10] sm:$0xf0] }
  0x2e   :  { %413 = vmatpush.bf16.msrb.mxu2 %v2228_v4  ;;  %v2268_v49 = vor.u32 %v1787_v43, %v1622_v45  ;;  %v1783_v54 = vld [vmem:[#allocation7 + $0xc] sm:$0xf]  ;;  %v1606_v55 = vld [vmem:[#allocation7 + $0x18] sm:$0xf0]  ;;  %v2272_v58 = vor.u32 %v1782_v50, %v1598_v53  ;;  %v2122_v60 = vmov 0   ;;  %s2123_s23 = smov [#allocation11]  }
  0x2f   :  { %388 = vmatpush.bf16.msra.mxu0 %v2234_v15  ;;  %v2276_v59 = vor.u32 %v1783_v54, %v1606_v55  ;;  %v105_v9 = vld [vmem:[#allocation8] sm:$0xf]  ;;  %s1560_s24 = sshll.u32 %s2123_s23, 4  ;;  %s1562_s27 = sshll.u32 %s2584_s6, 4  ;;  %s1561_s24 = int_to_ptr.vmem [resolvable:$true] %s1560_s24  ;;  %s1563_s27 = int_to_ptr.hbm [resolvable:$true] %s1562_s27 }
  0x30   :  { %v107_v10 = vperm.slane %v105_v9, 0  ;;  %v108_v17 = vperm.slane %v105_v9, 1  ;;  %v109_v23 = vperm.slane %v105_v9, 2 }
  0x31   :  { %400 = vmatpush.bf16.msra.mxu1 %v2236_v16  ;;  %426 = vmatpush.bf16.msrb.mxu3 %v2242_v20 }
  0x32   :  { %414 = vmatpush.bf16.msrb.mxu2 %v2240_v19 }
  0x33   :  { %389 = vmatpush.bf16.msra.mxu0 %v2248_v29 }
  0x35   :  { %401 = vmatpush.bf16.msra.mxu1 %v2250_v32  ;;  %427 = vmatpush.bf16.msrb.mxu3 %v2256_v13 }
  0x36   :  { %415 = vmatpush.bf16.msrb.mxu2 %v2254_v36 }
  0x37   :  { %390 = vmatpush.bf16.msra.mxu0 %v2260_v46 }
  0x39   :  { %402 = vmatpush.bf16.msra.mxu1 %v2262_v47  ;;  %428 = vmatpush.bf16.msrb.mxu3 %v2268_v49 }
  0x3a   :  { %416 = vmatpush.bf16.msrb.mxu2 %v2266_v48  ;;  %391 = vmatmul.bf16.vlgmr.msra.gmra.mxu0 %v2122_v60 }
  0x3b   :  { %503 = vmatpush.bf16.msrb.mxu0 %v2174_v8 }
  0x3d   :  { %403 = vmatpush.bf16.msra.mxu1 %v2272_v58  ;;  %417 = vmatmul.bf16.vlgmr.msrb.gmra.mxu2 %v2122_v60 }
  0x3e   :  { %529 = vmatpush.bf16.msra.mxu2 %v2176_v12  ;;  %429 = vmatpush.bf16.msrb.mxu3 %v2276_v59 }
  0x3f   :  { %504 = vmatpush.bf16.msrb.mxu0 %v2182_v22 }
  0x40   :  { %404 = vmatmul.bf16.vlgmr.msra.gmra.mxu1 %v2122_v60 }
  0x41   :  { %516 = vmatpush.bf16.msrb.mxu1 %v2186_v26  ;;  %430 = vmatmul.bf16.vlgmr.msrb.gmra.mxu3 %v2122_v60  ;;  %v110_v60 = vperm.slane %v105_v9, 3 }
  0x42   :  { %542 = vmatpush.bf16.msra.mxu3 %v2190_v31  ;;  %530 = vmatpush.bf16.msra.mxu2 %v2188_v30 }
  0x43   :  { %505 = vmatpush.bf16.msrb.mxu0 %v2194_v35 }
  0x45   :  { %517 = vmatpush.bf16.msrb.mxu1 %v2198_v39 }
  0x46   :  { %543 = vmatpush.bf16.msra.mxu3 %v2202_v44  ;;  %531 = vmatpush.bf16.msra.mxu2 %v2200_v40 }
  0x47   :  { %506 = vmatpush.bf16.msrb.mxu0 %v2210_v51 }
  0x49   :  { %518 = vmatpush.bf16.msrb.mxu1 %v2212_v52 }
  0x4a   :  { %544 = vmatpush.bf16.msra.mxu3 %v2218_v57  ;;  %532 = vmatpush.bf16.msra.mxu2 %v2216_v56 }
  0x4b   :  { %507 = vmatpush.bf16.msrb.mxu0 %v2222_v0 }
  0x4d   :  { %519 = vmatpush.bf16.msrb.mxu1 %v2224_v1 }
  0x4e   :  { %545 = vmatpush.bf16.msra.mxu3 %v2230_v5  ;;  %533 = vmatpush.bf16.msra.mxu2 %v2228_v4 }
  0x4f   :  { %508 = vmatpush.bf16.msrb.mxu0 %v2234_v15 }
  0x51   :  { %520 = vmatpush.bf16.msrb.mxu1 %v2236_v16 }
  0x52   :  { %546 = vmatpush.bf16.msra.mxu3 %v2242_v20  ;;  %534 = vmatpush.bf16.msra.mxu2 %v2240_v19 }
  0x53   :  { %509 = vmatpush.bf16.msrb.mxu0 %v2248_v29 }
  0x55   :  { %521 = vmatpush.bf16.msrb.mxu1 %v2250_v32 }
  0x56   :  { %547 = vmatpush.bf16.msra.mxu3 %v2256_v13  ;;  %535 = vmatpush.bf16.msra.mxu2 %v2254_v36 }
  0x57   :  { %510 = vmatpush.bf16.msrb.mxu0 %v2260_v46 }
  0x59   :  { %522 = vmatpush.bf16.msrb.mxu1 %v2262_v47 }
  0x5a   :  { %548 = vmatpush.bf16.msra.mxu3 %v2268_v49  ;;  %536 = vmatpush.bf16.msra.mxu2 %v2266_v48 }
  0x5b   :  { %642 = vmatpush.bf16.msra.mxu0 %v2174_v8 }
  0x5d   :  { %523 = vmatpush.bf16.msrb.mxu1 %v2272_v58 }
  0x5e   :  { %668 = vmatpush.bf16.msrb.mxu2 %v2176_v12  ;;  %549 = vmatpush.bf16.msra.mxu3 %v2276_v59 }
  0x5f   :  { %643 = vmatpush.bf16.msra.mxu0 %v2182_v22 }
  0x61   :  { %655 = vmatpush.bf16.msra.mxu1 %v2186_v26 }
  0x62   :  { %681 = vmatpush.bf16.msrb.mxu3 %v2190_v31  ;;  %669 = vmatpush.bf16.msrb.mxu2 %v2188_v30 }
  0x63   :  { %644 = vmatpush.bf16.msra.mxu0 %v2194_v35 }
  0x65   :  { %656 = vmatpush.bf16.msra.mxu1 %v2198_v39 }
  0x66   :  { %682 = vmatpush.bf16.msrb.mxu3 %v2202_v44  ;;  %670 = vmatpush.bf16.msrb.mxu2 %v2200_v40 }
  0x67   :  { %645 = vmatpush.bf16.msra.mxu0 %v2210_v51 }
  0x69   :  { %657 = vmatpush.bf16.msra.mxu1 %v2212_v52 }
  0x6a   :  { %683 = vmatpush.bf16.msrb.mxu3 %v2218_v57  ;;  %671 = vmatpush.bf16.msrb.mxu2 %v2216_v56 }
  0x6b   :  { %646 = vmatpush.bf16.msra.mxu0 %v2222_v0 }
  0x6d   :  { %658 = vmatpush.bf16.msra.mxu1 %v2224_v1 }
  0x6e   :  { %684 = vmatpush.bf16.msrb.mxu3 %v2230_v5  ;;  %672 = vmatpush.bf16.msrb.mxu2 %v2228_v4 }
  0x6f   :  { %647 = vmatpush.bf16.msra.mxu0 %v2234_v15 }
  0x71   :  { %659 = vmatpush.bf16.msra.mxu1 %v2236_v16 }
  0x72   :  { %685 = vmatpush.bf16.msrb.mxu3 %v2242_v20  ;;  %673 = vmatpush.bf16.msrb.mxu2 %v2240_v19 }
  0x73   :  { %648 = vmatpush.bf16.msra.mxu0 %v2248_v29 }
  0x75   :  { %660 = vmatpush.bf16.msra.mxu1 %v2250_v32 }
  0x76   :  { %686 = vmatpush.bf16.msrb.mxu3 %v2256_v13  ;;  %674 = vmatpush.bf16.msrb.mxu2 %v2254_v36 }
  0x77   :  { %649 = vmatpush.bf16.msra.mxu0 %v2260_v46 }
  0x79   :  { %661 = vmatpush.bf16.msra.mxu1 %v2262_v47 }
  0x7a   :  { %687 = vmatpush.bf16.msrb.mxu3 %v2268_v49  ;;  %675 = vmatpush.bf16.msrb.mxu2 %v2266_v48 }
  0x7d   :  { %662 = vmatpush.bf16.msra.mxu1 %v2272_v58 }
  0x7e   :  { %688 = vmatpush.bf16.msrb.mxu3 %v2276_v59 }
  0x99   :  { %v148_v61 = vpop.f32.mrf.mxu1 }
  0x9a   :  { %v2344_v14 = vadd.f32 %v148_v61, %v107_v10 }
  0xa1   :  { %v150_v62 = vpop.f32.mrf.mxu1 }
  0xa2   :  { %v174_v63 = vpop.f32.mrf.mxu2 }
  0xa3   :  { %v187_v2 = vpop.f32.mrf.mxu3  ;;  %v2350_v33 = vadd.f32 %v174_v63, %v109_v23 }
  0xa9   :  { %v161_v3 = vpop.f32.mrf.mxu1 }
  0xaa   :  { %v176_v6 = vpop.f32.mrf.mxu2  ;;  %v2347_v24 = vadd.f32 %v161_v3, %v108_v17 }
  0xab   :  { %v189_v7 = vpop.f32.mrf.mxu3 }
  0xac   :  { %v2353_v7 = vadd.f32 %v187_v2, %v110_v60 }
  0xb1   :  { %v163_v11 = vpop.f32.mrf.mxu1 }
  0xb7   :  { %v392_v18 = vpop.f32.mrf.mxu0 }
  0xb8   :  { %v435_v21 = vadd.f32 %v392_v18, %v2344_v14 }
  0xba   :  { %v1722_v25 = vmul.f32 -1.442695, %v435_v21 }
  0xbc   :  { %1833 = vpow2.f32 %v1722_v25 }
  0xbd   :  { %v405_v27 = vpop.f32.mrf.mxu1 }
  0xbe   :  { %v436_v28 = vadd.f32 %v405_v27, %v2347_v24 }
  0xbf   :  { %v394_v41 = vpop.f32.mrf.mxu0 }
  0xc0   :  { %v1723_v34 = vmul.f32 -1.442695, %v436_v28  ;;  %v418_v37 = vpop.f32.mrf.mxu2 }
  0xc1   :  { %v437_v38 = vadd.f32 %v418_v37, %v2350_v33 }
  0xc2   :  { %1835 = vpow2.f32 %v1723_v34  ;;  %v1834_v43 = vpop.eup %1833 }
  0xc3   :  { %v1724_v42 = vmul.f32 -1.442695, %v437_v38  ;;  %v448_v50 = vadd.f32 1.0, %v1834_v43 }
  0xc4   :  { %v431_v45 = vpop.f32.mrf.mxu3 }
  0xc5   :  { %1837 = vpow2.f32 %v1724_v42  ;;  %v407_v53 = vpop.f32.mrf.mxu1  ;;  %v438_v18 = vadd.f32 %v431_v45, %v2353_v7  ;;  %v462_v25 = vand.u32 2147483648, %v448_v50  ;;  %vm456_vm2 = vweird.f32 %v448_v50 }
  0xc6   :  { %1839 = vrcp.f32 %v448_v50  ;;  %v460_v34 = vand.u32 2147483647, %v448_v50 }
  0xc7   :  { %v463_v53 = vor.u32 1.1754944e-38, %v462_v25 }
  0xc8   :  { %v1836_v54 = vpop.eup %1835  ;;  %v420_v55 = vpop.f32.mrf.mxu2  ;;  %vm461_vm6 = vcmp.eq.f32.partialorder %v460_v34, 8.507059e+37 }
  0xc9   :  { %v449_v61 = vadd.f32 1.0, %v1836_v54 }
  0xcb   :  { %v1838_v62 = vpop.eup %1837  ;;  %1841 = vrcp.f32 %v449_v61  ;;  %v477_v37 = vand.u32 2147483648, %v449_v61  ;;  %v475_v42 = vand.u32 2147483647, %v449_v61  ;;  %vm471_vm5 = vweird.f32 %v449_v61 }
  0xcc   :  { %v450_v63 = vadd.f32 1.0, %v1838_v62  ;;  %v433_v3 = vpop.f32.mrf.mxu3  ;;  %v1840_v6 = vpop.eup %1839 }
  0xcd   :  { %v452_v10 = vmul.f32 %v1840_v6, %v448_v50  ;;  %vm457_vm1 = vweird.f32 %v1840_v6  ;;  %v478_v54 = vor.u32 1.1754944e-38, %v477_v37  ;;  %vm476_vm8 = vcmp.eq.f32.partialorder %v475_v42, 8.507059e+37 }
  0xce   :  { %1843 = vrcp.f32 %v450_v63  ;;  %vm458_vm3 = vmor %vm456_vm2, %vm457_vm1  ;;  %vm486_vm10 = vweird.f32 %v450_v63 }
  0xcf   :  { %v453_v11 = vsub.f32 1.0, %v452_v10  ;;  %1845 = vtanh.f32 %v438_v18 }
  0xd1   :  { %v1842_v17 = vpop.eup %1841  ;;  %v454_v23 = vmul.f32 %v1840_v6, %v453_v11 }
  0xd2   :  { %v467_v21 = vmul.f32 %v1842_v17, %v449_v61  ;;  %vm472_vm4 = vweird.f32 %v1842_v17  ;;  %v490_v61 = vand.u32 2147483647, %v450_v63 }
  0xd3   :  { %v455_v28 = vadd.f32 %v1840_v6, %v454_v23  ;;  %vm473_vm7 = vmor %vm471_vm5, %vm472_vm4 }
  0xd4   :  { %v1844_v27 = vpop.eup %1843  ;;  %v468_v9 = vsub.f32 1.0, %v467_v21  ;;  %v492_v21 = vand.u32 2147483648, %v450_v63  ;;  %vm491_vm12 = vcmp.eq.f32.partialorder %v490_v61, 8.507059e+37 }
  0xd5   :  { %v482_v38 = vmul.f32 %v1844_v27, %v450_v63  ;;  %v459_v41 = vsel %vm458_vm3, %v1840_v6, %v455_v28  ;;  %v1846_v62 = vpop.eup %1845  ;;  %vm487_vm9 = vweird.f32 %v1844_v27 }
  0xd6   :  { %v469_v2 = vmul.f32 %v1842_v17, %v468_v9  ;;  %v464_v55 = vsel %vm461_vm6, %v463_v53, %v459_v41  ;;  %vm488_vm11 = vmor %vm486_vm10, %vm487_vm9  ;;  %v493_v25 = vor.u32 1.1754944e-38, %v492_v21 }
  0xd7   :  { %v483_v43 = vsub.f32 1.0, %v482_v38  ;;  %v498_v11 = vmul.f32 %v1846_v62, %v464_v55 }
  0xd8   :  { %v470_v45 = vadd.f32 %v1842_v17, %v469_v2 }
  0xd9   :  { %v484_v3 = vmul.f32 %v1844_v27, %v483_v43 }
  0xda   :  { %v474_v60 = vsel %vm473_vm7, %v1842_v17, %v470_v45 }
  0xdb   :  { %v479_v50 = vsel %vm476_vm8, %v478_v54, %v474_v60  ;;  %v485_v6 = vadd.f32 %v1844_v27, %v484_v3 }
  0xdc   :  { %v497_v10 = vmul.f32 0.0, %v479_v50 }
  0xdd   :  { %v489_v23 = vsel %vm488_vm11, %v1844_v27, %v485_v6 }
  0xde   :  { %v2356_v18 = vadd.f32 %v498_v11, %v497_v10  ;;  %v494_v9 = vsel %vm491_vm12, %v493_v25, %v489_v23 }
  0xe0   :  { %1847 = vtanh.f32 %v2356_v18 }
  0xe6   :  { %v1848_v17 = vpop.eup %1847 }
  0xe7   :  { %v501_v28 = vmul.f32 %v1848_v17, %v494_v9 }
  0xe9   :  { %v502_v34 = vpack.c.bf16 %v501_v28, %v501_v28 }
  0xeb   :  { %511 = vmatmul.bf16.vlgmr.msrb.gmra.mxu0 %v502_v34  ;;  %524 = vmatmul.bf16.vlgmr.msrb.gmra.mxu1 %v502_v34 }
  0xec   :  { %537 = vmatmul.bf16.vlgmr.msra.gmra.mxu2 %v502_v34  ;;  %550 = vmatmul.bf16.vlgmr.msra.gmra.mxu3 %v502_v34 }
  0xed   :  { %780 = vmatpush.bf16.msrb.mxu0 %v2174_v8  ;;  %793 = vmatpush.bf16.msrb.mxu1 %v2186_v26 }
  0xee   :  { %806 = vmatpush.bf16.msra.mxu2 %v2176_v12  ;;  %819 = vmatpush.bf16.msra.mxu3 %v2190_v31 }
  0xf1   :  { %781 = vmatpush.bf16.msrb.mxu0 %v2182_v22  ;;  %794 = vmatpush.bf16.msrb.mxu1 %v2198_v39 }
  0xf2   :  { %807 = vmatpush.bf16.msra.mxu2 %v2188_v30  ;;  %820 = vmatpush.bf16.msra.mxu3 %v2202_v44 }
  0xf5   :  { %782 = vmatpush.bf16.msrb.mxu0 %v2194_v35  ;;  %795 = vmatpush.bf16.msrb.mxu1 %v2212_v52 }
  0xf6   :  { %808 = vmatpush.bf16.msra.mxu2 %v2200_v40  ;;  %821 = vmatpush.bf16.msra.mxu3 %v2218_v57 }
  0xf9   :  { %783 = vmatpush.bf16.msrb.mxu0 %v2210_v51  ;;  %796 = vmatpush.bf16.msrb.mxu1 %v2224_v1 }
  0xfa   :  { %809 = vmatpush.bf16.msra.mxu2 %v2216_v56  ;;  %822 = vmatpush.bf16.msra.mxu3 %v2230_v5 }
  0xfd   :  { %784 = vmatpush.bf16.msrb.mxu0 %v2222_v0  ;;  %797 = vmatpush.bf16.msrb.mxu1 %v2236_v16 }
  0xfe   :  { %810 = vmatpush.bf16.msra.mxu2 %v2228_v4  ;;  %823 = vmatpush.bf16.msra.mxu3 %v2242_v20 }
 0x101   :  { %785 = vmatpush.bf16.msrb.mxu0 %v2234_v15  ;;  %798 = vmatpush.bf16.msrb.mxu1 %v2250_v32 }
 0x102   :  { %811 = vmatpush.bf16.msra.mxu2 %v2240_v19  ;;  %824 = vmatpush.bf16.msra.mxu3 %v2256_v13 }
 0x105   :  { %786 = vmatpush.bf16.msrb.mxu0 %v2248_v29  ;;  %799 = vmatpush.bf16.msrb.mxu1 %v2262_v47 }
 0x106   :  { %812 = vmatpush.bf16.msra.mxu2 %v2254_v36  ;;  %825 = vmatpush.bf16.msra.mxu3 %v2268_v49 }
 0x109   :  { %787 = vmatpush.bf16.msrb.mxu0 %v2260_v46  ;;  %800 = vmatpush.bf16.msrb.mxu1 %v2272_v58 }
 0x10a   :  { %813 = vmatpush.bf16.msra.mxu2 %v2266_v48  ;;  %826 = vmatpush.bf16.msra.mxu3 %v2276_v59 }
 0x168   :  { %v512_v63 = vpop.f32.mrf.mxu0  ;;  %v525_v27 = vpop.f32.mrf.mxu1 }
 0x169   :  { %v559_v37 = vrot.slane %v512_v63, 7  ;;  %v560_v38 = vrot.slane %v525_v27, 7 }
 0x16b   :  { %v567_v2 = vadd.f32 %v559_v37, %v2344_v14  ;;  %v568_v41 = vadd.f32 %v560_v38, %v2347_v24 }
 0x16d   :  { %v1725_v42 = vmul.f32 -1.442695, %v567_v2  ;;  %v1726_v43 = vmul.f32 -1.442695, %v568_v41 }
 0x16f   :  { %1849 = vpow2.f32 %v1725_v42  ;;  %v538_v53 = vpop.f32.mrf.mxu2  ;;  %v551_v45 = vpop.f32.mrf.mxu3 }
 0x170   :  { %1851 = vpow2.f32 %v1726_v43  ;;  %v561_v54 = vrot.slane %v538_v53, 7  ;;  %v514_v55 = vpop.f32.mrf.mxu0  ;;  %v527_v60 = vpop.f32.mrf.mxu1  ;;  %v562_v23 = vrot.slane %v551_v45, 7 }
 0x172   :  { %v569_v62 = vadd.f32 %v561_v54, %v2350_v33  ;;  %v570_v28 = vadd.f32 %v562_v23, %v2353_v7 }
 0x174   :  { %v1727_v50 = vmul.f32 -1.442695, %v569_v62 }
 0x175   :  { %v1850_v3 = vpop.eup %1849 }
 0x176   :  { %v1852_v10 = vpop.eup %1851  ;;  %v580_v11 = vadd.f32 1.0, %v1850_v3  ;;  %1853 = vpow2.f32 %v1727_v50  ;;  %v630_v3 = vrot.slane %v2356_v18, 7 }
 0x177   :  { %v581_v6 = vadd.f32 1.0, %v1852_v10  ;;  %v540_v21 = vpop.f32.mrf.mxu2  ;;  %v553_v61 = vpop.f32.mrf.mxu3 }
 0x178   :  { %1855 = vrcp.f32 %v580_v11  ;;  %v594_v2 = vand.u32 2147483648, %v580_v11  ;;  %v592_v43 = vand.u32 2147483647, %v580_v11  ;;  %vm588_vm15 = vweird.f32 %v580_v11 }
 0x179   :  { %1857 = vrcp.f32 %v581_v6  ;;  %v609_v41 = vand.u32 2147483648, %v581_v6  ;;  %v607_v45 = vand.u32 2147483647, %v581_v6  ;;  %vm603_vm0 = vweird.f32 %v581_v6 }
 0x17a   :  { %v595_v62 = vor.u32 1.1754944e-38, %v594_v2  ;;  %vm593_vm3 = vcmp.eq.f32.partialorder %v592_v43, 8.507059e+37 }
 0x17b   :  { %v610_v10 = vor.u32 1.1754944e-38, %v609_v41  ;;  %vm608_vm4 = vcmp.eq.f32.partialorder %v607_v45, 8.507059e+37 }
 0x17c   :  { %v1854_v25 = vpop.eup %1853 }
 0x17d   :  { %v582_v17 = vadd.f32 1.0, %v1854_v25 }
 0x17e   :  { %v1856_v9 = vpop.eup %1855 }
 0x17f   :  { %v1858_v34 = vpop.eup %1857  ;;  %v584_v63 = vmul.f32 %v1856_v9, %v580_v11  ;;  %1859 = vrcp.f32 %v582_v17  ;;  %vm589_vm13 = vweird.f32 %v1856_v9  ;;  %v624_v18 = vand.u32 2147483648, %v582_v17 }
 0x180   :  { %v599_v27 = vmul.f32 %v1858_v34, %v581_v6  ;;  %1861 = vtanh.f32 %v570_v28  ;;  %vm604_vm14 = vweird.f32 %v1858_v34  ;;  %vm590_vm1 = vmor %vm588_vm15, %vm589_vm13  ;;  %vm618_vm6 = vweird.f32 %v582_v17 }
 0x181   :  { %v585_v37 = vsub.f32 1.0, %v584_v63  ;;  %vm605_vm2 = vmor %vm603_vm0, %vm604_vm14  ;;  %v622_v2 = vand.u32 2147483647, %v582_v17  ;;  %v625_v41 = vor.u32 1.1754944e-38, %v624_v18 }
 0x182   :  { %v600_v38 = vsub.f32 1.0, %v599_v27 }
 0x183   :  { %v586_v42 = vmul.f32 %v1856_v9, %v585_v37  ;;  %vm623_vm8 = vcmp.eq.f32.partialorder %v622_v2, 8.507059e+37 }
 0x184   :  { %v601_v53 = vmul.f32 %v1858_v34, %v600_v38 }
 0x185   :  { %v1860_v54 = vpop.eup %1859  ;;  %v587_v55 = vadd.f32 %v1856_v9, %v586_v42 }
 0x186   :  { %v614_v60 = vmul.f32 %v1860_v54, %v582_v17  ;;  %v602_v50 = vadd.f32 %v1858_v34, %v601_v53  ;;  %v1862_v61 = vpop.eup %1861  ;;  %vm619_vm5 = vweird.f32 %v1860_v54 }
 0x187   :  { %v591_v21 = vsel %vm590_vm1, %v1856_v9, %v587_v55  ;;  %vm620_vm7 = vmor %vm618_vm6, %vm619_vm5 }
 0x188   :  { %v615_v23 = vsub.f32 1.0, %v614_v60  ;;  %v596_v25 = vsel %vm593_vm3, %v595_v62, %v591_v21  ;;  %v606_v28 = vsel %vm605_vm2, %v1858_v34, %v602_v50 }
 0x189   :  { %v611_v63 = vsel %vm608_vm4, %v610_v10, %v606_v28  ;;  %v633_v27 = vmul.f32 %v1862_v61, %v596_v25 }
 0x18a   :  { %v632_v37 = vmul.f32 %v630_v3, %v611_v63  ;;  %v616_v11 = vmul.f32 %v1860_v54, %v615_v23 }
 0x18c   :  { %v2396_v6 = vadd.f32 %v633_v27, %v632_v37  ;;  %v617_v38 = vadd.f32 %v1860_v54, %v616_v11 }
 0x18e   :  { %1863 = vtanh.f32 %v2396_v6  ;;  %v621_v9 = vsel %vm620_vm7, %v1860_v54, %v617_v38 }
 0x18f   :  { %v626_v34 = vsel %vm623_vm8, %v625_v41, %v621_v9 }
 0x194   :  { %v1864_v42 = vpop.eup %1863 }
 0x195   :  { %v636_v43 = vmul.f32 %v1864_v42, %v626_v34 }
 0x197   :  { %v637_v53 = vpack.c.bf16 %v636_v43, %v636_v43 }
 0x199   :  { %v639_v45 = vshrl.u32 %v637_v53, 16 }
 0x19b   :  { %650 = vmatmul.bf16.vlgmr.msra.gmra.mxu0 %v639_v45  ;;  %663 = vmatmul.bf16.vlgmr.msra.gmra.mxu1 %v639_v45 }
 0x19c   :  { %676 = vmatmul.bf16.vlgmr.msrb.gmra.mxu2 %v639_v45  ;;  %689 = vmatmul.bf16.vlgmr.msrb.gmra.mxu3 %v639_v45 }
 0x19d   :  { %920 = vmatpush.bf16.msra.mxu0 %v2174_v8  ;;  %933 = vmatpush.bf16.msra.mxu1 %v2186_v26 }
 0x19e   :  { %946 = vmatpush.bf16.msrb.mxu2 %v2176_v12  ;;  %959 = vmatpush.bf16.msrb.mxu3 %v2190_v31 }
 0x1a1   :  { %921 = vmatpush.bf16.msra.mxu0 %v2182_v22  ;;  %934 = vmatpush.bf16.msra.mxu1 %v2198_v39 }
 0x1a2   :  { %947 = vmatpush.bf16.msrb.mxu2 %v2188_v30  ;;  %960 = vmatpush.bf16.msrb.mxu3 %v2202_v44 }
 0x1a5   :  { %922 = vmatpush.bf16.msra.mxu0 %v2194_v35  ;;  %935 = vmatpush.bf16.msra.mxu1 %v2212_v52 }
 0x1a6   :  { %948 = vmatpush.bf16.msrb.mxu2 %v2200_v40  ;;  %961 = vmatpush.bf16.msrb.mxu3 %v2218_v57 }
 0x1a9   :  { %923 = vmatpush.bf16.msra.mxu0 %v2210_v51  ;;  %936 = vmatpush.bf16.msra.mxu1 %v2224_v1 }
 0x1aa   :  { %949 = vmatpush.bf16.msrb.mxu2 %v2216_v56  ;;  %962 = vmatpush.bf16.msrb.mxu3 %v2230_v5 }
 0x1ad   :  { %924 = vmatpush.bf16.msra.mxu0 %v2222_v0  ;;  %937 = vmatpush.bf16.msra.mxu1 %v2236_v16 }
 0x1ae   :  { %950 = vmatpush.bf16.msrb.mxu2 %v2228_v4  ;;  %963 = vmatpush.bf16.msrb.mxu3 %v2242_v20 }
 0x1b1   :  { %925 = vmatpush.bf16.msra.mxu0 %v2234_v15  ;;  %938 = vmatpush.bf16.msra.mxu1 %v2250_v32 }
 0x1b2   :  { %951 = vmatpush.bf16.msrb.mxu2 %v2240_v19  ;;  %964 = vmatpush.bf16.msrb.mxu3 %v2256_v13 }
 0x1b5   :  { %926 = vmatpush.bf16.msra.mxu0 %v2248_v29  ;;  %939 = vmatpush.bf16.msra.mxu1 %v2262_v47 }
 0x1b6   :  { %952 = vmatpush.bf16.msrb.mxu2 %v2254_v36  ;;  %965 = vmatpush.bf16.msrb.mxu3 %v2268_v49 }
 0x1b9   :  { %927 = vmatpush.bf16.msra.mxu0 %v2260_v46  ;;  %940 = vmatpush.bf16.msra.mxu1 %v2272_v58 }
 0x1ba   :  { %953 = vmatpush.bf16.msrb.mxu2 %v2266_v48  ;;  %966 = vmatpush.bf16.msrb.mxu3 %v2276_v59 }
 0x218   :  { %v651_v17 = vpop.f32.mrf.mxu0  ;;  %v664_v54 = vpop.f32.mrf.mxu1 }
 0x219   :  { %v698_v55 = vrot.slane %v651_v17, 6  ;;  %v699_v60 = vrot.slane %v664_v54, 6 }
 0x21b   :  { %v706_v62 = vadd.f32 %v698_v55, %v2344_v14  ;;  %v707_v50 = vadd.f32 %v699_v60, %v2347_v24 }
 0x21d   :  { %v1728_v3 = vmul.f32 -1.442695, %v706_v62  ;;  %v1729_v10 = vmul.f32 -1.442695, %v707_v50 }
 0x21f   :  { %1865 = vpow2.f32 %v1728_v3  ;;  %v677_v21 = vpop.f32.mrf.mxu2  ;;  %v690_v61 = vpop.f32.mrf.mxu3 }
 0x220   :  { %1867 = vpow2.f32 %v1729_v10  ;;  %v700_v23 = vrot.slane %v677_v21, 6  ;;  %v653_v25 = vpop.f32.mrf.mxu0  ;;  %v666_v28 = vpop.f32.mrf.mxu1  ;;  %v701_v41 = vrot.slane %v690_v61, 6 }
 0x222   :  { %v708_v63 = vadd.f32 %v700_v23, %v2350_v33  ;;  %v709_v53 = vadd.f32 %v701_v41, %v2353_v7 }
 0x224   :  { %v1730_v27 = vmul.f32 -1.442695, %v708_v63 }
 0x225   :  { %v1866_v37 = vpop.eup %1865 }
 0x226   :  { %v1868_v11 = vpop.eup %1867  ;;  %v719_v38 = vadd.f32 1.0, %v1866_v37  ;;  %1869 = vpow2.f32 %v1730_v27  ;;  %v769_v37 = vrot.slane %v2396_v6, 7 }
 0x227   :  { %v720_v18 = vadd.f32 1.0, %v1868_v11  ;;  %v679_v2 = vpop.f32.mrf.mxu2  ;;  %v692_v9 = vpop.f32.mrf.mxu3 }
 0x228   :  { %1871 = vrcp.f32 %v719_v38  ;;  %v733_v62 = vand.u32 2147483648, %v719_v38  ;;  %v731_v10 = vand.u32 2147483647, %v719_v38  ;;  %vm727_vm11 = vweird.f32 %v719_v38 }
 0x229   :  { %1873 = vrcp.f32 %v720_v18  ;;  %v748_v50 = vand.u32 2147483648, %v720_v18  ;;  %v746_v61 = vand.u32 2147483647, %v720_v18  ;;  %vm742_vm12 = vweird.f32 %v720_v18 }
 0x22a   :  { %v734_v63 = vor.u32 1.1754944e-38, %v733_v62  ;;  %vm732_vm15 = vcmp.eq.f32.partialorder %v731_v10, 8.507059e+37 }
 0x22b   :  { %v749_v11 = vor.u32 1.1754944e-38, %v748_v50  ;;  %vm747_vm0 = vcmp.eq.f32.partialorder %v746_v61, 8.507059e+37 }
 0x22c   :  { %v1870_v42 = vpop.eup %1869 }
 0x22d   :  { %v721_v34 = vadd.f32 1.0, %v1870_v42 }
 0x22e   :  { %v1872_v43 = vpop.eup %1871 }
 0x22f   :  { %v1874_v45 = vpop.eup %1873  ;;  %v723_v17 = vmul.f32 %v1872_v43, %v719_v38  ;;  %1875 = vrcp.f32 %v721_v34  ;;  %vm728_vm9 = vweird.f32 %v1872_v43  ;;  %v763_v6 = vand.u32 2147483648, %v721_v34 }
 0x230   :  { %v738_v54 = vmul.f32 %v1874_v45, %v720_v18  ;;  %1877 = vtanh.f32 %v709_v53  ;;  %vm743_vm10 = vweird.f32 %v1874_v45  ;;  %vm729_vm13 = vmor %vm727_vm11, %vm728_vm9  ;;  %vm757_vm2 = vweird.f32 %v721_v34 }
 0x231   :  { %v724_v55 = vsub.f32 1.0, %v723_v17  ;;  %vm744_vm14 = vmor %vm742_vm12, %vm743_vm10  ;;  %v761_v62 = vand.u32 2147483647, %v721_v34  ;;  %v764_v50 = vor.u32 1.1754944e-38, %v763_v6 }
 0x232   :  { %v739_v60 = vsub.f32 1.0, %v738_v54 }
 0x233   :  { %v725_v3 = vmul.f32 %v1872_v43, %v724_v55  ;;  %vm762_vm4 = vcmp.eq.f32.partialorder %v761_v62, 8.507059e+37 }
 0x234   :  { %v740_v21 = vmul.f32 %v1874_v45, %v739_v60 }
 0x235   :  { %v1876_v23 = vpop.eup %1875  ;;  %v726_v25 = vadd.f32 %v1872_v43, %v725_v3 }
 0x236   :  { %v753_v28 = vmul.f32 %v1876_v23, %v721_v34  ;;  %v741_v27 = vadd.f32 %v1874_v45, %v740_v21  ;;  %v1878_v9 = vpop.eup %1877  ;;  %vm758_vm1 = vweird.f32 %v1876_v23 }
 0x237   :  { %v730_v2 = vsel %vm729_vm13, %v1872_v43, %v726_v25  ;;  %vm759_vm3 = vmor %vm757_vm2, %vm758_vm1 }
 0x238   :  { %v754_v41 = vsub.f32 1.0, %v753_v28  ;;  %v735_v42 = vsel %vm732_vm15, %v734_v63, %v730_v2  ;;  %v745_v53 = vsel %vm744_vm14, %v1874_v45, %v741_v27 }
 0x239   :  { %v750_v17 = vsel %vm747_vm0, %v749_v11, %v745_v53  ;;  %v772_v54 = vmul.f32 %v1878_v9, %v735_v42 }
 0x23a   :  { %v771_v55 = vmul.f32 %v769_v37, %v750_v17  ;;  %v755_v38 = vmul.f32 %v1876_v23, %v754_v41 }
 0x23c   :  { %v2436_v18 = vadd.f32 %v772_v54, %v771_v55  ;;  %v756_v60 = vadd.f32 %v1876_v23, %v755_v38 }
 0x23e   :  { %1879 = vtanh.f32 %v2436_v18  ;;  %v760_v43 = vsel %vm759_vm3, %v1876_v23, %v756_v60 }
 0x23f   :  { %v765_v45 = vsel %vm762_vm4, %v764_v50, %v760_v43 }
 0x244   :  { %v1880_v3 = vpop.eup %1879 }
 0x245   :  { %v775_v10 = vmul.f32 %v1880_v3, %v765_v45 }
 0x247   :  { %v776_v21 = vpack.c.bf16 %v775_v10, %v775_v10 }
 0x249   :  { %v778_v61 = vrot.slane %v776_v21, 1 }
 0x24b   :  { %788 = vmatmul.bf16.vlgmr.msrb.gmra.mxu0 %v778_v61  ;;  %801 = vmatmul.bf16.vlgmr.msrb.gmra.mxu1 %v778_v61 }
 0x24c   :  { %814 = vmatmul.bf16.vlgmr.msra.gmra.mxu2 %v778_v61  ;;  %827 = vmatmul.bf16.vlgmr.msra.gmra.mxu3 %v778_v61 }
 0x24d   :  { %1058 = vmatpush.bf16.msrb.mxu0 %v2174_v8  ;;  %1071 = vmatpush.bf16.msrb.mxu1 %v2186_v26 }
 0x24e   :  { %1084 = vmatpush.bf16.msra.mxu2 %v2176_v12  ;;  %1097 = vmatpush.bf16.msra.mxu3 %v2190_v31 }
 0x251   :  { %1059 = vmatpush.bf16.msrb.mxu0 %v2182_v22  ;;  %1072 = vmatpush.bf16.msrb.mxu1 %v2198_v39 }
 0x252   :  { %1085 = vmatpush.bf16.msra.mxu2 %v2188_v30  ;;  %1098 = vmatpush.bf16.msra.mxu3 %v2202_v44 }
 0x255   :  { %1060 = vmatpush.bf16.msrb.mxu0 %v2194_v35  ;;  %1073 = vmatpush.bf16.msrb.mxu1 %v2212_v52 }
 0x256   :  { %1086 = vmatpush.bf16.msra.mxu2 %v2200_v40  ;;  %1099 = vmatpush.bf16.msra.mxu3 %v2218_v57 }
 0x259   :  { %1061 = vmatpush.bf16.msrb.mxu0 %v2210_v51  ;;  %1074 = vmatpush.bf16.msrb.mxu1 %v2224_v1 }
 0x25a   :  { %1087 = vmatpush.bf16.msra.mxu2 %v2216_v56  ;;  %1100 = vmatpush.bf16.msra.mxu3 %v2230_v5 }
 0x25d   :  { %1062 = vmatpush.bf16.msrb.mxu0 %v2222_v0  ;;  %1075 = vmatpush.bf16.msrb.mxu1 %v2236_v16 }
 0x25e   :  { %1088 = vmatpush.bf16.msra.mxu2 %v2228_v4  ;;  %1101 = vmatpush.bf16.msra.mxu3 %v2242_v20 }
 0x261   :  { %1063 = vmatpush.bf16.msrb.mxu0 %v2234_v15  ;;  %1076 = vmatpush.bf16.msrb.mxu1 %v2250_v32 }
 0x262   :  { %1089 = vmatpush.bf16.msra.mxu2 %v2240_v19  ;;  %1102 = vmatpush.bf16.msra.mxu3 %v2256_v13 }
 0x265   :  { %1064 = vmatpush.bf16.msrb.mxu0 %v2248_v29  ;;  %1077 = vmatpush.bf16.msrb.mxu1 %v2262_v47 }
 0x266   :  { %1090 = vmatpush.bf16.msra.mxu2 %v2254_v36  ;;  %1103 = vmatpush.bf16.msra.mxu3 %v2268_v49 }
 0x269   :  { %1065 = vmatpush.bf16.msrb.mxu0 %v2260_v46  ;;  %1078 = vmatpush.bf16.msrb.mxu1 %v2272_v58 }
 0x26a   :  { %1091 = vmatpush.bf16.msra.mxu2 %v2266_v48  ;;  %1104 = vmatpush.bf16.msra.mxu3 %v2276_v59 }
 0x2c8   :  { %v789_v34 = vpop.f32.mrf.mxu0  ;;  %v802_v23 = vpop.f32.mrf.mxu1 }
 0x2c9   :  { %v836_v25 = vrot.slane %v789_v34, 5  ;;  %v837_v28 = vrot.slane %v802_v23, 5 }
 0x2cb   :  { %v844_v63 = vadd.f32 %v836_v25, %v2344_v14  ;;  %v845_v27 = vadd.f32 %v837_v28, %v2347_v24 }
 0x2cd   :  { %v1731_v37 = vmul.f32 -1.442695, %v844_v63  ;;  %v1732_v11 = vmul.f32 -1.442695, %v845_v27 }
 0x2cf   :  { %1881 = vpow2.f32 %v1731_v37  ;;  %v815_v2 = vpop.f32.mrf.mxu2  ;;  %v828_v9 = vpop.f32.mrf.mxu3 }
 0x2d0   :  { %1883 = vpow2.f32 %v1732_v11  ;;  %v838_v41 = vrot.slane %v815_v2, 5  ;;  %v791_v42 = vpop.f32.mrf.mxu0  ;;  %v804_v53 = vpop.f32.mrf.mxu1  ;;  %v839_v50 = vrot.slane %v828_v9, 5 }
 0x2d2   :  { %v846_v17 = vadd.f32 %v838_v41, %v2350_v33  ;;  %v847_v21 = vadd.f32 %v839_v50, %v2353_v7 }
 0x2d4   :  { %v1733_v54 = vmul.f32 -1.442695, %v846_v17 }
 0x2d5   :  { %v1882_v55 = vpop.eup %1881 }
 0x2d6   :  { %v1884_v38 = vpop.eup %1883  ;;  %v857_v60 = vadd.f32 1.0, %v1882_v55  ;;  %1885 = vpow2.f32 %v1733_v54  ;;  %v907_v55 = vrot.slane %v2436_v18, 7 }
 0x2d7   :  { %v858_v6 = vadd.f32 1.0, %v1884_v38  ;;  %v817_v62 = vpop.f32.mrf.mxu2  ;;  %v830_v43 = vpop.f32.mrf.mxu3 }
 0x2d8   :  { %1887 = vrcp.f32 %v857_v60  ;;  %v871_v63 = vand.u32 2147483648, %v857_v60  ;;  %v869_v11 = vand.u32 2147483647, %v857_v60  ;;  %vm865_vm7 = vweird.f32 %v857_v60 }
 0x2d9   :  { %1889 = vrcp.f32 %v858_v6  ;;  %v886_v27 = vand.u32 2147483648, %v858_v6  ;;  %v884_v9 = vand.u32 2147483647, %v858_v6  ;;  %vm880_vm8 = vweird.f32 %v858_v6 }
 0x2da   :  { %v872_v17 = vor.u32 1.1754944e-38, %v871_v63  ;;  %vm870_vm11 = vcmp.eq.f32.partialorder %v869_v11, 8.507059e+37 }
 0x2db   :  { %v887_v38 = vor.u32 1.1754944e-38, %v886_v27  ;;  %vm885_vm12 = vcmp.eq.f32.partialorder %v884_v9, 8.507059e+37 }
 0x2dc   :  { %v1886_v3 = vpop.eup %1885 }
 0x2dd   :  { %v859_v45 = vadd.f32 1.0, %v1886_v3 }
 0x2de   :  { %v1888_v10 = vpop.eup %1887 }
 0x2df   :  { %v1890_v61 = vpop.eup %1889  ;;  %v861_v34 = vmul.f32 %v1888_v10, %v857_v60  ;;  %1891 = vrcp.f32 %v859_v45  ;;  %vm866_vm5 = vweird.f32 %v1888_v10  ;;  %v901_v18 = vand.u32 2147483648, %v859_v45 }
 0x2e0   :  { %v876_v23 = vmul.f32 %v1890_v61, %v858_v6  ;;  %1893 = vtanh.f32 %v847_v21  ;;  %vm881_vm6 = vweird.f32 %v1890_v61  ;;  %vm867_vm9 = vmor %vm865_vm7, %vm866_vm5  ;;  %vm895_vm14 = vweird.f32 %v859_v45 }
 0x2e1   :  { %v862_v25 = vsub.f32 1.0, %v861_v34  ;;  %vm882_vm10 = vmor %vm880_vm8, %vm881_vm6  ;;  %v899_v63 = vand.u32 2147483647, %v859_v45  ;;  %v902_v27 = vor.u32 1.1754944e-38, %v901_v18 }
 0x2e2   :  { %v877_v28 = vsub.f32 1.0, %v876_v23 }
 0x2e3   :  { %v863_v37 = vmul.f32 %v1888_v10, %v862_v25  ;;  %vm900_vm0 = vcmp.eq.f32.partialorder %v899_v63, 8.507059e+37 }
 0x2e4   :  { %v878_v2 = vmul.f32 %v1890_v61, %v877_v28 }
 0x2e5   :  { %v1892_v41 = vpop.eup %1891  ;;  %v864_v42 = vadd.f32 %v1888_v10, %v863_v37 }
 0x2e6   :  { %v891_v53 = vmul.f32 %v1892_v41, %v859_v45  ;;  %v879_v54 = vadd.f32 %v1890_v61, %v878_v2  ;;  %v1894_v43 = vpop.eup %1893  ;;  %vm896_vm13 = vweird.f32 %v1892_v41 }
 0x2e7   :  { %v868_v62 = vsel %vm867_vm9, %v1888_v10, %v864_v42  ;;  %vm897_vm15 = vmor %vm895_vm14, %vm896_vm13 }
 0x2e8   :  { %v892_v50 = vsub.f32 1.0, %v891_v53  ;;  %v873_v3 = vsel %vm870_vm11, %v872_v17, %v868_v62  ;;  %v883_v21 = vsel %vm882_vm10, %v1890_v61, %v879_v54 }
 0x2e9   :  { %v888_v34 = vsel %vm885_vm12, %v887_v38, %v883_v21  ;;  %v910_v23 = vmul.f32 %v1894_v43, %v873_v3 }
 0x2ea   :  { %v909_v25 = vmul.f32 %v907_v55, %v888_v34  ;;  %v893_v60 = vmul.f32 %v1892_v41, %v892_v50 }
 0x2ec   :  { %v2476_v6 = vadd.f32 %v910_v23, %v909_v25  ;;  %v894_v28 = vadd.f32 %v1892_v41, %v893_v60 }
 0x2ee   :  { %1895 = vtanh.f32 %v2476_v6  ;;  %v898_v10 = vsel %vm897_vm15, %v1892_v41, %v894_v28 }
 0x2ef   :  { %v903_v61 = vsel %vm900_vm0, %v902_v27, %v898_v10 }
 0x2f4   :  { %v1896_v37 = vpop.eup %1895 }
 0x2f5   :  { %v913_v11 = vmul.f32 %v1896_v37, %v903_v61 }
 0x2f7   :  { %v914_v2 = vpack.c.bf16 %v913_v11, %v913_v11 }
 0x2f9   :  { %v916_v9 = vshrl.u32 %v914_v2, 16 }
 0x2fb   :  { %v918_v42 = vrot.slane %v916_v9, 1 }
 0x2fd   :  { %928 = vmatmul.bf16.vlgmr.msra.gmra.mxu0 %v918_v42  ;;  %941 = vmatmul.bf16.vlgmr.msra.gmra.mxu1 %v918_v42 }
 0x2fe   :  { %954 = vmatmul.bf16.vlgmr.msrb.gmra.mxu2 %v918_v42  ;;  %967 = vmatmul.bf16.vlgmr.msrb.gmra.mxu3 %v918_v42 }
 0x2ff   :  { %1198 = vmatpush.bf16.msra.mxu0 %v2174_v8  ;;  %1211 = vmatpush.bf16.msra.mxu1 %v2186_v26 }
 0x300   :  { %1224 = vmatpush.bf16.msrb.mxu2 %v2176_v12  ;;  %1237 = vmatpush.bf16.msrb.mxu3 %v2190_v31 }
 0x303   :  { %1199 = vmatpush.bf16.msra.mxu0 %v2182_v22  ;;  %1212 = vmatpush.bf16.msra.mxu1 %v2198_v39 }
 0x304   :  { %1225 = vmatpush.bf16.msrb.mxu2 %v2188_v30  ;;  %1238 = vmatpush.bf16.msrb.mxu3 %v2202_v44 }
 0x307   :  { %1200 = vmatpush.bf16.msra.mxu0 %v2194_v35  ;;  %1213 = vmatpush.bf16.msra.mxu1 %v2212_v52 }
 0x308   :  { %1226 = vmatpush.bf16.msrb.mxu2 %v2200_v40  ;;  %1239 = vmatpush.bf16.msrb.mxu3 %v2218_v57 }
 0x30b   :  { %1201 = vmatpush.bf16.msra.mxu0 %v2210_v51  ;;  %1214 = vmatpush.bf16.msra.mxu1 %v2224_v1 }
 0x30c   :  { %1227 = vmatpush.bf16.msrb.mxu2 %v2216_v56  ;;  %1240 = vmatpush.bf16.msrb.mxu3 %v2230_v5 }
 0x30f   :  { %1202 = vmatpush.bf16.msra.mxu0 %v2222_v0  ;;  %1215 = vmatpush.bf16.msra.mxu1 %v2236_v16 }
 0x310   :  { %1228 = vmatpush.bf16.msrb.mxu2 %v2228_v4  ;;  %1241 = vmatpush.bf16.msrb.mxu3 %v2242_v20 }
 0x313   :  { %1203 = vmatpush.bf16.msra.mxu0 %v2234_v15  ;;  %1216 = vmatpush.bf16.msra.mxu1 %v2250_v32 }
 0x314   :  { %1229 = vmatpush.bf16.msrb.mxu2 %v2240_v19  ;;  %1242 = vmatpush.bf16.msrb.mxu3 %v2256_v13 }
 0x317   :  { %1204 = vmatpush.bf16.msra.mxu0 %v2248_v29  ;;  %1217 = vmatpush.bf16.msra.mxu1 %v2262_v47 }
 0x318   :  { %1230 = vmatpush.bf16.msrb.mxu2 %v2254_v36  ;;  %1243 = vmatpush.bf16.msrb.mxu3 %v2268_v49 }
 0x31b   :  { %1205 = vmatpush.bf16.msra.mxu0 %v2260_v46  ;;  %1218 = vmatpush.bf16.msra.mxu1 %v2272_v58 }
 0x31c   :  { %1231 = vmatpush.bf16.msrb.mxu2 %v2266_v48  ;;  %1244 = vmatpush.bf16.msrb.mxu3 %v2276_v59 }
 0x37a   :  { %v929_v45 = vpop.f32.mrf.mxu0  ;;  %v942_v41 = vpop.f32.mrf.mxu1 }
 0x37b   :  { %v976_v53 = vrot.slane %v929_v45, 4  ;;  %v977_v17 = vrot.slane %v942_v41, 4 }
 0x37d   :  { %v984_v54 = vadd.f32 %v976_v53, %v2344_v14  ;;  %v985_v55 = vadd.f32 %v977_v17, %v2347_v24 }
 0x37f   :  { %v1734_v38 = vmul.f32 -1.442695, %v984_v54  ;;  %v1735_v62 = vmul.f32 -1.442695, %v985_v55 }
 0x381   :  { %1897 = vpow2.f32 %v1734_v38  ;;  %v955_v43 = vpop.f32.mrf.mxu2  ;;  %v968_v50 = vpop.f32.mrf.mxu3 }
 0x382   :  { %1899 = vpow2.f32 %v1735_v62  ;;  %v978_v3 = vrot.slane %v955_v43, 4  ;;  %v931_v21 = vpop.f32.mrf.mxu0  ;;  %v944_v34 = vpop.f32.mrf.mxu1  ;;  %v979_v37 = vrot.slane %v968_v50, 4 }
 0x384   :  { %v986_v23 = vadd.f32 %v978_v3, %v2350_v33  ;;  %v987_v9 = vadd.f32 %v979_v37, %v2353_v7 }
 0x386   :  { %v1736_v25 = vmul.f32 -1.442695, %v986_v23 }
 0x387   :  { %v1898_v60 = vpop.eup %1897 }
 0x388   :  { %v1900_v28 = vpop.eup %1899  ;;  %v997_v18 = vadd.f32 1.0, %v1898_v60  ;;  %1901 = vpow2.f32 %v1736_v25  ;;  %v1047_v60 = vrot.slane %v2476_v6, 7 }
 0x389   :  { %v998_v63 = vadd.f32 1.0, %v1900_v28  ;;  %v957_v10 = vpop.f32.mrf.mxu2  ;;  %v970_v27 = vpop.f32.mrf.mxu3 }
 0x38a   :  { %1903 = vrcp.f32 %v997_v18  ;;  %v1011_v54 = vand.u32 2147483648, %v997_v18  ;;  %v1009_v62 = vand.u32 2147483647, %v997_v18  ;;  %vm1005_vm3 = vweird.f32 %v997_v18 }
 0x38b   :  { %1905 = vrcp.f32 %v998_v63  ;;  %v1026_v55 = vand.u32 2147483648, %v998_v63  ;;  %v1024_v50 = vand.u32 2147483647, %v998_v63  ;;  %vm1020_vm4 = vweird.f32 %v998_v63 }
 0x38c   :  { %v1012_v23 = vor.u32 1.1754944e-38, %v1011_v54  ;;  %vm1010_vm7 = vcmp.eq.f32.partialorder %v1009_v62, 8.507059e+37 }
 0x38d   :  { %v1027_v28 = vor.u32 1.1754944e-38, %v1026_v55  ;;  %vm1025_vm8 = vcmp.eq.f32.partialorder %v1024_v50, 8.507059e+37 }
 0x38e   :  { %v1902_v61 = vpop.eup %1901 }
 0x38f   :  { %v999_v11 = vadd.f32 1.0, %v1902_v61 }
 0x390   :  { %v1904_v2 = vpop.eup %1903 }
 0x391   :  { %v1906_v42 = vpop.eup %1905  ;;  %v1001_v45 = vmul.f32 %v1904_v2, %v997_v18  ;;  %1907 = vrcp.f32 %v999_v11  ;;  %vm1006_vm1 = vweird.f32 %v1904_v2  ;;  %v1041_v6 = vand.u32 2147483648, %v999_v11 }
 0x392   :  { %v1016_v41 = vmul.f32 %v1906_v42, %v998_v63  ;;  %1909 = vtanh.f32 %v987_v9  ;;  %vm1021_vm2 = vweird.f32 %v1906_v42  ;;  %vm1007_vm5 = vmor %vm1005_vm3, %vm1006_vm1  ;;  %vm1035_vm10 = vweird.f32 %v999_v11 }
 0x393   :  { %v1002_v53 = vsub.f32 1.0, %v1001_v45  ;;  %vm1022_vm6 = vmor %vm1020_vm4, %vm1021_vm2  ;;  %v1039_v54 = vand.u32 2147483647, %v999_v11  ;;  %v1042_v55 = vor.u32 1.1754944e-38, %v1041_v6 }
 0x394   :  { %v1017_v17 = vsub.f32 1.0, %v1016_v41 }
 0x395   :  { %v1003_v38 = vmul.f32 %v1904_v2, %v1002_v53  ;;  %vm1040_vm12 = vcmp.eq.f32.partialorder %v1039_v54, 8.507059e+37 }
 0x396   :  { %v1018_v43 = vmul.f32 %v1906_v42, %v1017_v17 }
 0x397   :  { %v1908_v3 = vpop.eup %1907  ;;  %v1004_v21 = vadd.f32 %v1904_v2, %v1003_v38 }
 0x398   :  { %v1031_v34 = vmul.f32 %v1908_v3, %v999_v11  ;;  %v1019_v25 = vadd.f32 %v1906_v42, %v1018_v43  ;;  %v1910_v27 = vpop.eup %1909  ;;  %vm1036_vm9 = vweird.f32 %v1908_v3 }
 0x399   :  { %v1008_v10 = vsel %vm1007_vm5, %v1904_v2, %v1004_v21  ;;  %vm1037_vm11 = vmor %vm1035_vm10, %vm1036_vm9 }
 0x39a   :  { %v1032_v37 = vsub.f32 1.0, %v1031_v34  ;;  %v1013_v61 = vsel %vm1010_vm7, %v1012_v23, %v1008_v10  ;;  %v1023_v9 = vsel %vm1022_vm6, %v1906_v42, %v1019_v25 }
 0x39b   :  { %v1028_v45 = vsel %vm1025_vm8, %v1027_v28, %v1023_v9  ;;  %v1050_v41 = vmul.f32 %v1910_v27, %v1013_v61 }
 0x39c   :  { %v1049_v53 = vmul.f32 %v1047_v60, %v1028_v45  ;;  %v1033_v18 = vmul.f32 %v1908_v3, %v1032_v37 }
 0x39e   :  { %v2516_v63 = vadd.f32 %v1050_v41, %v1049_v53  ;;  %v1034_v17 = vadd.f32 %v1908_v3, %v1033_v18 }
 0x3a0   :  { %1911 = vtanh.f32 %v2516_v63  ;;  %v1038_v2 = vsel %vm1037_vm11, %v1908_v3, %v1034_v17  ;;  %v1185_v37 = vrot.slane %v2516_v63, 7 }
 0x3a1   :  { %v1043_v42 = vsel %vm1040_vm12, %v1042_v55, %v1038_v2 }
 0x3a6   :  { %v1912_v38 = vpop.eup %1911 }
 0x3a7   :  { %v1053_v62 = vmul.f32 %v1912_v38, %v1043_v42 }
 0x3a9   :  { %v1054_v43 = vpack.c.bf16 %v1053_v62, %v1053_v62 }
 0x3ab   :  { %v1056_v50 = vrot.slane %v1054_v43, 2 }
 0x3ad   :  { %1066 = vmatmul.bf16.vlgmr.msrb.gmra.mxu0 %v1056_v50  ;;  %1079 = vmatmul.bf16.vlgmr.msrb.gmra.mxu1 %v1056_v50 }
 0x3ae   :  { %1092 = vmatmul.bf16.vlgmr.msra.gmra.mxu2 %v1056_v50  ;;  %1105 = vmatmul.bf16.vlgmr.msra.gmra.mxu3 %v1056_v50 }
 0x3af   :  { %1336 = vmatpush.bf16.msrb.mxu0 %v2174_v8  ;;  %1349 = vmatpush.bf16.msrb.mxu1 %v2186_v26 }
 0x3b0   :  { %1362 = vmatpush.bf16.msra.mxu2 %v2176_v12  ;;  %1375 = vmatpush.bf16.msra.mxu3 %v2190_v31 }
 0x3b3   :  { %1337 = vmatpush.bf16.msrb.mxu0 %v2182_v22  ;;  %1350 = vmatpush.bf16.msrb.mxu1 %v2198_v39 }
 0x3b4   :  { %1363 = vmatpush.bf16.msra.mxu2 %v2188_v30  ;;  %1376 = vmatpush.bf16.msra.mxu3 %v2202_v44 }
 0x3b7   :  { %1338 = vmatpush.bf16.msrb.mxu0 %v2194_v35  ;;  %1351 = vmatpush.bf16.msrb.mxu1 %v2212_v52 }
 0x3b8   :  { %1364 = vmatpush.bf16.msra.mxu2 %v2200_v40  ;;  %1377 = vmatpush.bf16.msra.mxu3 %v2218_v57 }
 0x3bb   :  { %1339 = vmatpush.bf16.msrb.mxu0 %v2210_v51  ;;  %1352 = vmatpush.bf16.msrb.mxu1 %v2224_v1 }
 0x3bc   :  { %1365 = vmatpush.bf16.msra.mxu2 %v2216_v56  ;;  %1378 = vmatpush.bf16.msra.mxu3 %v2230_v5 }
 0x3bf   :  { %1340 = vmatpush.bf16.msrb.mxu0 %v2222_v0  ;;  %1353 = vmatpush.bf16.msrb.mxu1 %v2236_v16 }
 0x3c0   :  { %1366 = vmatpush.bf16.msra.mxu2 %v2228_v4  ;;  %1379 = vmatpush.bf16.msra.mxu3 %v2242_v20 }
 0x3c3   :  { %1341 = vmatpush.bf16.msrb.mxu0 %v2234_v15  ;;  %1354 = vmatpush.bf16.msrb.mxu1 %v2250_v32 }
 0x3c4   :  { %1367 = vmatpush.bf16.msra.mxu2 %v2240_v19  ;;  %1380 = vmatpush.bf16.msra.mxu3 %v2256_v13 }
 0x3c7   :  { %1342 = vmatpush.bf16.msrb.mxu0 %v2248_v29  ;;  %1355 = vmatpush.bf16.msrb.mxu1 %v2262_v47 }
 0x3c8   :  { %1368 = vmatpush.bf16.msra.mxu2 %v2254_v36  ;;  %1381 = vmatpush.bf16.msra.mxu3 %v2268_v49 }
 0x3cb   :  { %1343 = vmatpush.bf16.msrb.mxu0 %v2260_v46  ;;  %1356 = vmatpush.bf16.msrb.mxu1 %v2272_v58 }
 0x3cc   :  { %1369 = vmatpush.bf16.msra.mxu2 %v2266_v48  ;;  %1382 = vmatpush.bf16.msra.mxu3 %v2276_v59 }
 0x42a   :  { %v1067_v8 = vpop.f32.mrf.mxu0  ;;  %v1080_v12 = vpop.f32.mrf.mxu1 }
 0x42b   :  { %v1114_v22 = vrot.slane %v1067_v8, 3  ;;  %v1115_v26 = vrot.slane %v1080_v12, 3 }
 0x42d   :  { %v1122_v30 = vadd.f32 %v1114_v22, %v2344_v14  ;;  %v1123_v31 = vadd.f32 %v1115_v26, %v2347_v24 }
 0x42f   :  { %v1737_v35 = vmul.f32 -1.442695, %v1122_v30  ;;  %v1738_v39 = vmul.f32 -1.442695, %v1123_v31 }
 0x431   :  { %1913 = vpow2.f32 %v1737_v35  ;;  %v1093_v40 = vpop.f32.mrf.mxu2  ;;  %v1106_v44 = vpop.f32.mrf.mxu3 }
 0x432   :  { %1915 = vpow2.f32 %v1738_v39  ;;  %v1116_v51 = vrot.slane %v1093_v40, 3  ;;  %v1069_v52 = vpop.f32.mrf.mxu0  ;;  %v1082_v56 = vpop.f32.mrf.mxu1  ;;  %v1117_v20 = vrot.slane %v1106_v44, 3 }
 0x434   :  { %v1124_v57 = vadd.f32 %v1116_v51, %v2350_v33  ;;  %v1125_v13 = vadd.f32 %v1117_v20, %v2353_v7 }
 0x436   :  { %v1739_v0 = vmul.f32 -1.442695, %v1124_v57 }
 0x437   :  { %v1914_v1 = vpop.eup %1913 }
 0x438   :  { %v1916_v4 = vpop.eup %1915  ;;  %v1135_v5 = vadd.f32 1.0, %v1914_v1  ;;  %1917 = vpow2.f32 %v1739_v0 }
 0x439   :  { %v1136_v15 = vadd.f32 1.0, %v1916_v4  ;;  %v1095_v16 = vpop.f32.mrf.mxu2  ;;  %v1108_v19 = vpop.f32.mrf.mxu3 }
 0x43a   :  { %1919 = vrcp.f32 %v1135_v5  ;;  %v1149_v59 = vand.u32 2147483648, %v1135_v5  ;;  %v1147_v21 = vand.u32 2147483647, %v1135_v5  ;;  %vm1143_vm15 = vweird.f32 %v1135_v5 }
 0x43b   :  { %1921 = vrcp.f32 %v1136_v15  ;;  %v1164_v11 = vand.u32 2147483648, %v1136_v15  ;;  %v1162_v23 = vand.u32 2147483647, %v1136_v15  ;;  %vm1158_vm0 = vweird.f32 %v1136_v15 }
 0x43c   :  { %v1150_v10 = vor.u32 1.1754944e-38, %v1149_v59  ;;  %vm1148_vm3 = vcmp.eq.f32.partialorder %v1147_v21, 8.507059e+37 }
 0x43d   :  { %v1165_v61 = vor.u32 1.1754944e-38, %v1164_v11  ;;  %vm1163_vm4 = vcmp.eq.f32.partialorder %v1162_v23, 8.507059e+37 }
 0x43e   :  { %v1918_v29 = vpop.eup %1917 }
 0x43f   :  { %v1137_v32 = vadd.f32 1.0, %v1918_v29 }
 0x440   :  { %v1920_v36 = vpop.eup %1919 }
 0x441   :  { %v1922_v46 = vpop.eup %1921  ;;  %v1139_v47 = vmul.f32 %v1920_v36, %v1135_v5  ;;  %1923 = vrcp.f32 %v1137_v32  ;;  %vm1144_vm13 = vweird.f32 %v1920_v36  ;;  %v1179_v63 = vand.u32 2147483648, %v1137_v32 }
 0x442   :  { %v1154_v48 = vmul.f32 %v1922_v46, %v1136_v15  ;;  %1925 = vtanh.f32 %v1125_v13  ;;  %vm1159_vm14 = vweird.f32 %v1922_v46  ;;  %vm1145_vm1 = vmor %vm1143_vm15, %vm1144_vm13  ;;  %vm1173_vm6 = vweird.f32 %v1137_v32 }
 0x443   :  { %v1140_v49 = vsub.f32 1.0, %v1139_v47  ;;  %vm1160_vm2 = vmor %vm1158_vm0, %vm1159_vm14  ;;  %v1177_v42 = vand.u32 2147483647, %v1137_v32  ;;  %v1180_v43 = vor.u32 1.1754944e-38, %v1179_v63 }
 0x444   :  { %v1155_v58 = vsub.f32 1.0, %v1154_v48 }
 0x445   :  { %v1141_v3 = vmul.f32 %v1920_v36, %v1140_v49  ;;  %vm1178_vm8 = vcmp.eq.f32.partialorder %v1177_v42, 8.507059e+37 }
 0x446   :  { %v1156_v34 = vmul.f32 %v1922_v46, %v1155_v58 }
 0x447   :  { %v1924_v25 = vpop.eup %1923  ;;  %v1142_v60 = vadd.f32 %v1920_v36, %v1141_v3 }
 0x448   :  { %v1169_v28 = vmul.f32 %v1924_v25, %v1137_v32  ;;  %v1157_v27 = vadd.f32 %v1922_v46, %v1156_v34  ;;  %v1926_v45 = vpop.eup %1925  ;;  %vm1174_vm5 = vweird.f32 %v1924_v25 }
 0x449   :  { %v1146_v9 = vsel %vm1145_vm1, %v1920_v36, %v1142_v60  ;;  %vm1175_vm7 = vmor %vm1173_vm6, %vm1174_vm5 }
 0x44a   :  { %v1170_v41 = vsub.f32 1.0, %v1169_v28  ;;  %v1151_v53 = vsel %vm1148_vm3, %v1150_v10, %v1146_v9  ;;  %v1161_v18 = vsel %vm1160_vm2, %v1922_v46, %v1157_v27 }
 0x44b   :  { %v1166_v17 = vsel %vm1163_vm4, %v1165_v61, %v1161_v18  ;;  %v1188_v6 = vmul.f32 %v1926_v45, %v1151_v53 }
 0x44c   :  { %v1187_v54 = vmul.f32 %v1185_v37, %v1166_v17  ;;  %v1171_v2 = vmul.f32 %v1924_v25, %v1170_v41 }
 0x44e   :  { %v2556_v55 = vadd.f32 %v1188_v6, %v1187_v54  ;;  %v1172_v38 = vadd.f32 %v1924_v25, %v1171_v2 }
 0x450   :  { %1927 = vtanh.f32 %v2556_v55  ;;  %v1176_v62 = vsel %vm1175_vm7, %v1924_v25, %v1172_v38  ;;  %v1325_v53 = vrot.slane %v2556_v55, 7 }
 0x451   :  { %v1181_v8 = vsel %vm1178_vm8, %v1180_v43, %v1176_v62 }
 0x456   :  { %v1928_v50 = vpop.eup %1927 }
 0x457   :  { %v1191_v12 = vmul.f32 %v1928_v50, %v1181_v8 }
 0x459   :  { %v1192_v22 = vpack.c.bf16 %v1191_v12, %v1191_v12 }
 0x45b   :  { %v1194_v26 = vshrl.u32 %v1192_v22, 16 }
 0x45d   :  { %v1196_v30 = vrot.slane %v1194_v26, 2 }
 0x45f   :  { %1206 = vmatmul.bf16.vlgmr.msra.gmra.mxu0 %v1196_v30  ;;  %1219 = vmatmul.bf16.vlgmr.msra.gmra.mxu1 %v1196_v30 }
 0x460   :  { %1232 = vmatmul.bf16.vlgmr.msrb.gmra.mxu2 %v1196_v30  ;;  %1245 = vmatmul.bf16.vlgmr.msrb.gmra.mxu3 %v1196_v30 }
 0x4dc   :  { %v1207_v31 = vpop.f32.mrf.mxu0  ;;  %v1220_v35 = vpop.f32.mrf.mxu1 }
 0x4dd   :  { %v1254_v39 = vrot.slane %v1207_v31, 2  ;;  %v1255_v40 = vrot.slane %v1220_v35, 2 }
 0x4df   :  { %v1262_v44 = vadd.f32 %v1254_v39, %v2344_v14  ;;  %v1263_v51 = vadd.f32 %v1255_v40, %v2347_v24 }
 0x4e1   :  { %v1740_v52 = vmul.f32 -1.442695, %v1262_v44  ;;  %v1741_v56 = vmul.f32 -1.442695, %v1263_v51  ;;  %v1821_v44 = vld [vmem:[#allocation10 + $0x38] sm:$0xff]  ;;  %v1820_v51 = vld [vmem:[#allocation10 + $0x30] sm:$0xff] }
 0x4e2   :  { %1541 = vmatpush.bf16.msra.mxu0 %v1821_v44 }
 0x4e3   :  { %1929 = vpow2.f32 %v1740_v52  ;;  %v1233_v57 = vpop.f32.mrf.mxu2  ;;  %v1246_v0 = vpop.f32.mrf.mxu3  ;;  %v1819_v52 = vld [vmem:[#allocation10 + $0x28] sm:$0xff] }
 0x4e4   :  { %1931 = vpow2.f32 %v1741_v56  ;;  %v1256_v1 = vrot.slane %v1233_v57, 2  ;;  %v1209_v4 = vpop.f32.mrf.mxu0  ;;  %v1222_v5 = vpop.f32.mrf.mxu1  ;;  %v1257_v46 = vrot.slane %v1246_v0, 2  ;;  %v1818_v0 = vld [vmem:[#allocation10 + $0x20] sm:$0xff] }
 0x4e6   :  { %v1264_v15 = vadd.f32 %v1256_v1, %v2350_v33  ;;  %v1265_v58 = vadd.f32 %v1257_v46, %v2353_v7  ;;  %1542 = vmatpush.bf16.msra.mxu0 %v1820_v51 }
 0x4e8   :  { %v1742_v16 = vmul.f32 -1.442695, %v1264_v15 }
 0x4e9   :  { %v1930_v19 = vpop.eup %1929 }
 0x4ea   :  { %v1932_v20 = vpop.eup %1931  ;;  %v1275_v29 = vadd.f32 1.0, %v1930_v19  ;;  %1933 = vpow2.f32 %v1742_v16  ;;  %1543 = vmatpush.bf16.msra.mxu0 %v1819_v52  ;;  %v1817_v16 = vld [vmem:[#allocation10 + $0x18] sm:$0xff] }
 0x4eb   :  { %v1276_v32 = vadd.f32 1.0, %v1932_v20  ;;  %v1235_v36 = vpop.f32.mrf.mxu2  ;;  %v1248_v13 = vpop.f32.mrf.mxu3 }
 0x4ec   :  { %1935 = vrcp.f32 %v1275_v29  ;;  %v1289_v23 = vand.u32 2147483648, %v1275_v29  ;;  %v1287_v28 = vand.u32 2147483647, %v1275_v29  ;;  %vm1283_vm11 = vweird.f32 %v1275_v29 }
 0x4ed   :  { %1937 = vrcp.f32 %v1276_v32  ;;  %v1304_v25 = vand.u32 2147483648, %v1276_v32  ;;  %v1302_v27 = vand.u32 2147483647, %v1276_v32  ;;  %vm1298_vm12 = vweird.f32 %v1276_v32 }
 0x4ee   :  { %v1290_v45 = vor.u32 1.1754944e-38, %v1289_v23  ;;  %vm1288_vm15 = vcmp.eq.f32.partialorder %v1287_v28, 8.507059e+37  ;;  %1544 = vmatpush.bf16.msra.mxu0 %v1818_v0 }
 0x4ef   :  { %v1305_v18 = vor.u32 1.1754944e-38, %v1304_v25  ;;  %vm1303_vm0 = vcmp.eq.f32.partialorder %v1302_v27, 8.507059e+37 }
 0x4f0   :  { %v1934_v47 = vpop.eup %1933 }
 0x4f1   :  { %v1277_v48 = vadd.f32 1.0, %v1934_v47 }
 0x4f2   :  { %v1936_v49 = vpop.eup %1935  ;;  %1545 = vmatpush.bf16.msra.mxu0 %v1817_v16 }
 0x4f3   :  { %v1938_v59 = vpop.eup %1937  ;;  %v1279_v11 = vmul.f32 %v1936_v49, %v1275_v29  ;;  %1939 = vrcp.f32 %v1277_v48  ;;  %vm1284_vm9 = vweird.f32 %v1936_v49  ;;  %v1319_v55 = vand.u32 2147483648, %v1277_v48  ;;  %v1816_v29 = vld [vmem:[#allocation10 + $0x10] sm:$0xff] }
 0x4f4   :  { %v1294_v3 = vmul.f32 %v1938_v59, %v1276_v32  ;;  %1941 = vtanh.f32 %v1265_v58  ;;  %vm1299_vm10 = vweird.f32 %v1938_v59  ;;  %vm1285_vm13 = vmor %vm1283_vm11, %vm1284_vm9  ;;  %vm1313_vm2 = vweird.f32 %v1277_v48 }
 0x4f5   :  { %v1280_v21 = vsub.f32 1.0, %v1279_v11  ;;  %vm1300_vm14 = vmor %vm1298_vm12, %vm1299_vm10  ;;  %v1317_v12 = vand.u32 2147483647, %v1277_v48  ;;  %v1320_v26 = vor.u32 1.1754944e-38, %v1319_v55  ;;  %v1814_v11 = vld [vmem:[#allocation10] sm:$0xff] }
 0x4f6   :  { %v1295_v34 = vsub.f32 1.0, %v1294_v3  ;;  %1546 = vmatpush.bf16.msra.mxu0 %v1816_v29 }
 0x4f7   :  { %v1281_v60 = vmul.f32 %v1936_v49, %v1280_v21  ;;  %vm1318_vm4 = vcmp.eq.f32.partialorder %v1317_v12, 8.507059e+37 }
 0x4f8   :  { %v1296_v10 = vmul.f32 %v1938_v59, %v1295_v34 }
 0x4f9   :  { %v1940_v37 = vpop.eup %1939  ;;  %v1282_v61 = vadd.f32 %v1936_v49, %v1281_v60 }
 0x4fa   :  { %v1309_v9 = vmul.f32 %v1940_v37, %v1277_v48  ;;  %v1297_v41 = vadd.f32 %v1938_v59, %v1296_v10  ;;  %v1942_v6 = vpop.eup %1941  ;;  %vm1314_vm1 = vweird.f32 %v1940_v37 }
 0x4fb   :  { %v1286_v17 = vsel %vm1285_vm13, %v1936_v49, %v1282_v61  ;;  %vm1315_vm3 = vmor %vm1313_vm2, %vm1314_vm1  ;;  %v1815_v49 = vld [vmem:[#allocation10 + $0x8] sm:$0xff] }
 0x4fc   :  { %v1310_v54 = vsub.f32 1.0, %v1309_v9  ;;  %v1291_v2 = vsel %vm1288_vm15, %v1290_v45, %v1286_v17  ;;  %v1301_v38 = vsel %vm1300_vm14, %v1938_v59, %v1297_v41  ;;  %1547 = vmatpush.bf16.msra.mxu0 %v1815_v49 }
 0x4fd   :  { %v1306_v63 = vsel %vm1303_vm0, %v1305_v18, %v1301_v38  ;;  %v1328_v42 = vmul.f32 %v1942_v6, %v1291_v2 }
 0x4fe   :  { %v1327_v62 = vmul.f32 %v1325_v53, %v1306_v63  ;;  %v1311_v43 = vmul.f32 %v1940_v37, %v1310_v54 }
 0x500   :  { %v2564_v50 = vadd.f32 %v1328_v42, %v1327_v62  ;;  %v1312_v8 = vadd.f32 %v1940_v37, %v1311_v43  ;;  %1548 = vmatpush.bf16.msra.mxu0 %v1814_v11 }
 0x502   :  { %1943 = vtanh.f32 %v2564_v50  ;;  %v1316_v22 = vsel %vm1315_vm3, %v1940_v37, %v1312_v8  ;;  %v1463_v42 = vrot.slane %v2564_v50, 7 }
 0x503   :  { %v1321_v31 = vsel %vm1318_vm4, %v1320_v26, %v1316_v22 }
 0x508   :  { %v1944_v30 = vpop.eup %1943 }
 0x509   :  { %v1331_v35 = vmul.f32 %v1944_v30, %v1321_v31 }
 0x50b   :  { %v1332_v39 = vpack.c.bf16 %v1331_v35, %v1331_v35 }
 0x50d   :  { %v1334_v40 = vrot.slane %v1332_v39, 3 }
 0x50f   :  { %1344 = vmatmul.bf16.vlgmr.msrb.gmra.mxu0 %v1334_v40  ;;  %1357 = vmatmul.bf16.vlgmr.msrb.gmra.mxu1 %v1334_v40 }
 0x510   :  { %1370 = vmatmul.bf16.vlgmr.msra.gmra.mxu2 %v1334_v40  ;;  %1383 = vmatmul.bf16.vlgmr.msra.gmra.mxu3 %v1334_v40 }
 0x58c   :  { %v1345_v56 = vpop.f32.mrf.mxu0  ;;  %v1358_v57 = vpop.f32.mrf.mxu1 }
 0x58d   :  { %v1392_v1 = vrot.slane %v1345_v56, 1  ;;  %v1393_v4 = vrot.slane %v1358_v57, 1 }
 0x58f   :  { %v1400_v5 = vadd.f32 %v1392_v1, %v2344_v14  ;;  %v1401_v15 = vadd.f32 %v1393_v4, %v2347_v24 }
 0x591   :  { %v1743_v19 = vmul.f32 -1.442695, %v1400_v5  ;;  %v1744_v20 = vmul.f32 -1.442695, %v1401_v15  ;;  %v1487_v15 = vld [vmem:[%s2583_s5] sm:$0x1] }
 0x593   :  { %1945 = vpow2.f32 %v1743_v19  ;;  %v1371_v32 = vpop.f32.mrf.mxu2  ;;  %v1384_v36 = vpop.f32.mrf.mxu3 }
 0x594   :  { %1947 = vpow2.f32 %v1744_v20  ;;  %v1394_v13 = vrot.slane %v1371_v32, 1  ;;  %v1347_v46 = vpop.f32.mrf.mxu0  ;;  %v1360_v47 = vpop.f32.mrf.mxu1  ;;  %v1395_v23 = vrot.slane %v1384_v36, 1 }
 0x596   :  { %v1402_v48 = vadd.f32 %v1394_v13, %v2350_v33  ;;  %v1403_v33 = vadd.f32 %v1395_v23, %v2353_v7 }
 0x598   :  { %v1745_v58 = vmul.f32 -1.442695, %v1402_v48 }
 0x599   :  { %v1946_v14 = vpop.eup %1945 }
 0x59a   :  { %v1948_v59 = vpop.eup %1947  ;;  %v1413_v24 = vadd.f32 1.0, %v1946_v14  ;;  %1949 = vpow2.f32 %v1745_v58 }
 0x59b   :  { %v1414_v3 = vadd.f32 1.0, %v1948_v59  ;;  %v1373_v21 = vpop.f32.mrf.mxu2  ;;  %v1386_v34 = vpop.f32.mrf.mxu3 }
 0x59c   :  { %1951 = vrcp.f32 %v1413_v24  ;;  %v1427_v45 = vand.u32 2147483648, %v1413_v24  ;;  %v1425_v18 = vand.u32 2147483647, %v1413_v24  ;;  %vm1421_vm7 = vweird.f32 %v1413_v24 }
 0x59d   :  { %1953 = vrcp.f32 %v1414_v3  ;;  %v1442_v41 = vand.u32 2147483648, %v1414_v3  ;;  %v1440_v6 = vand.u32 2147483647, %v1414_v3  ;;  %vm1436_vm8 = vweird.f32 %v1414_v3 }
 0x59e   :  { %v1428_v38 = vor.u32 1.1754944e-38, %v1427_v45  ;;  %vm1426_vm11 = vcmp.eq.f32.partialorder %v1425_v18, 8.507059e+37 }
 0x59f   :  { %v1443_v62 = vor.u32 1.1754944e-38, %v1442_v41  ;;  %vm1441_vm12 = vcmp.eq.f32.partialorder %v1440_v6, 8.507059e+37 }
 0x5a0   :  { %v1950_v25 = vpop.eup %1949 }
 0x5a1   :  { %v1415_v60 = vadd.f32 1.0, %v1950_v25 }
 0x5a2   :  { %v1952_v28 = vpop.eup %1951 }
 0x5a3   :  { %v1954_v10 = vpop.eup %1953  ;;  %v1417_v27 = vmul.f32 %v1952_v28, %v1413_v24  ;;  %1955 = vrcp.f32 %v1415_v60  ;;  %vm1422_vm5 = vweird.f32 %v1952_v28  ;;  %v1457_v44 = vand.u32 2147483648, %v1415_v60 }
 0x5a4   :  { %v1432_v37 = vmul.f32 %v1954_v10, %v1414_v3  ;;  %1957 = vtanh.f32 %v1403_v33  ;;  %vm1437_vm6 = vweird.f32 %v1954_v10  ;;  %vm1423_vm9 = vmor %vm1421_vm7, %vm1422_vm5  ;;  %vm1451_vm14 = vweird.f32 %v1415_v60 }
 0x5a5   :  { %v1418_v61 = vsub.f32 1.0, %v1417_v27  ;;  %vm1438_vm10 = vmor %vm1436_vm8, %vm1437_vm6  ;;  %v1455_v50 = vand.u32 2147483647, %v1415_v60  ;;  %v1458_v52 = vor.u32 1.1754944e-38, %v1457_v44 }
 0x5a6   :  { %v1433_v9 = vsub.f32 1.0, %v1432_v37 }
 0x5a7   :  { %v1419_v53 = vmul.f32 %v1952_v28, %v1418_v61  ;;  %vm1456_vm0 = vcmp.eq.f32.partialorder %v1455_v50, 8.507059e+37 }
 0x5a8   :  { %v1434_v17 = vmul.f32 %v1954_v10, %v1433_v9 }
 0x5a9   :  { %v1956_v54 = vpop.eup %1955  ;;  %v1420_v2 = vadd.f32 %v1952_v28, %v1419_v53 }
 0x5aa   :  { %v1447_v7 = vmul.f32 %v1956_v54, %v1415_v60  ;;  %v1435_v63 = vadd.f32 %v1954_v10, %v1434_v17  ;;  %v1958_v8 = vpop.eup %1957  ;;  %vm1452_vm13 = vweird.f32 %v1956_v54 }
 0x5ab   :  { %v1424_v43 = vsel %vm1423_vm9, %v1952_v28, %v1420_v2  ;;  %vm1453_vm15 = vmor %vm1451_vm14, %vm1452_vm13 }
 0x5ac   :  { %v1448_v55 = vsub.f32 1.0, %v1447_v7  ;;  %v1429_v12 = vsel %vm1426_vm11, %v1428_v38, %v1424_v43  ;;  %v1439_v22 = vsel %vm1438_vm10, %v1954_v10, %v1435_v63 }
 0x5ad   :  { %v1444_v26 = vsel %vm1441_vm12, %v1443_v62, %v1439_v22  ;;  %v1466_v30 = vmul.f32 %v1958_v8, %v1429_v12 }
 0x5ae   :  { %v1465_v31 = vmul.f32 %v1463_v42, %v1444_v26  ;;  %v1449_v35 = vmul.f32 %v1956_v54, %v1448_v55 }
 0x5b0   :  { %v1467_v39 = vadd.f32 %v1466_v30, %v1465_v31  ;;  %v1450_v40 = vadd.f32 %v1956_v54, %v1449_v35 }
 0x5b2   :  { %1959 = vtanh.f32 %v1467_v39  ;;  %v1454_v51 = vsel %vm1453_vm15, %v1956_v54, %v1450_v40 }
 0x5b3   :  { %v1459_v57 = vsel %vm1456_vm0, %v1458_v52, %v1454_v51 }
 0x5b8   :  { %v1960_v56 = vpop.eup %1959 }
 0x5b9   :  { %v1469_v0 = vmul.f32 %v1960_v56, %v1459_v57 }
 0x5bb   :  { %v1470_v1 = vpack.c.bf16 %v1469_v0, %v1469_v0 }
 0x5bd   :  { %v1489_v4 = vshrl.u32 %v1470_v1, 16 }
 0x5bf   :  { %v1491_v5 = vrot.slane %v1489_v4, 3 }
 0x5c1   :  { %1549 = vmatmul.bf16.vlgmr.msra.gmra.mxu0 %v1491_v5 }
 0x63e   :  { %v1550_v16 = vpop.f32.mrf.mxu0 }
 0x63f   :  { %v1551_v19 = vadd.f32 %v1550_v16, %v1487_v15 }
 0x641   :  { %1554 = vst [vmem:[#allocation11] sm:$0x1] %v1551_v19 }
 0x642   :  { %1565 = dma.vmem_to_hbm [thread:$0]  %s1561_s24, 16, %s1563_s27, [#allocation4]  }
 0x646   :  { %v1552_v20 = vpop.f32.mrf.mxu0 }
 0x647   :  { %2111 = dma.done.wait [#allocation4], 16  }
 0x648   :  { %2112 = vsyncadd [#allocation4], 4294967280 }
 0x649   :  { %1570 = vsyncpa [#allocation3], 1 }
 0x64a   :  { %1571 = vsyncpa [#allocation6], 1 }
 0x64b   :  { %1572 = vsyncpa [#allocation9], 1 }
 0x64c   :  { %1573 = vsyncpa [#allocation4], 1 }

</bundles_post_ra>
